<compile_context>
chip_gen: v7x
topology: tpu7x:2x2x1
jax: 0.10.0
libtpu: 0.0.40
codegen_flags: <defaults>
</compile_context>

<pallas_src>
import numpy as np

import jax
import jax.numpy as jnp
from jax.experimental import pallas as pl
from jax.experimental.pallas import tpu as pltpu


N_MEL = 80                       # in_dim (mel bins)
HIDDEN = 128                     # hidden_dim (lane-dense: == 128)
OUT_DIM = 128                    # out_dim
KERNEL = 5                       # conv kernel size
PAD = (KERNEL - 1) // 2
N_HEAD = 2                       # attention heads
D_HEAD = HIDDEN // N_HEAD
VMEM_LIMIT = 48 * 1024 * 1024    # <= v7x physical (64 MiB); raise toward 96 MiB on v5e/v6e for long T


def _mish(x):
    # mish(x) = x * tanh(softplus(x)), closed form (1 exp + 1 divide vs exp+log+tanh).
    # Stable with t = exp(-|x|):
    #   x >= 0: tanh(softplus(x)) = (1 + 2t) / (1 + 2t + 2t^2)
    #   x <  0: tanh(softplus(x)) = (2t + t^2) / (2 + 2t + t^2)
    t = jnp.exp(-jnp.abs(x))
    t2 = t * t
    pos = x >= 0
    num = jnp.where(pos, 1.0 + 2.0 * t, 2.0 * t + t2)
    den = jnp.where(pos, 1.0 + 2.0 * t + 2.0 * t2, 2.0 + 2.0 * t + t2)
    return x * num / den


def _sigmoid(x):
    # Overflow-free logistic via exp(-|x|).
    t = jnp.exp(-jnp.abs(x))
    return jnp.where(x >= 0, 1.0, t) / (1.0 + t)


def _conv1d_glu(x, wc_ref, bc):
    # Conv1d(k=5, same padding) + GLU + residual on a (T, C) f32 block.
    #   wc_ref: (K, C, 2C) bf16 taps; bc: (1, 2C) f32.
    # TODO(synk): replace padded-concat + shifted slices with pltpu.roll-based shifts
    #             (XLU) or a single im2col matmul to avoid sublane-misaligned slice
    #             relayouts at production T; needs on-HW validation before switching.
    T, C = x.shape
    zeros = jnp.zeros((PAD, C), jnp.float32)
    xp = jnp.concatenate([zeros, x, zeros], axis=0)                 # (T + K - 1, C)
    acc = bc                                                        # broadcasts on first add
    for k in range(KERNEL):                                         # 5 shifted bf16 matmuls
        tap = xp[k:k + T, :].astype(jnp.bfloat16)
        acc = acc + jnp.dot(tap, wc_ref[k], preferred_element_type=jnp.float32)
    val = acc[:, :C]
    gate = acc[:, C:]
    return x + val * _sigmoid(gate)                                 # residual + GLU


def _mel_style_kernel(mel_ref,
                      w1_ref, b1_ref, w2_ref, b2_ref,
                      cw1_ref, cb1_ref, cw2_ref, cb2_ref,
                      wq_ref, bq_ref, wk_ref, bk_ref, wv_ref, bv_ref,
                      wo_ref, bo_ref, wf_ref, bf_ref,
                      o_ref):
    f32, bf16 = jnp.float32, jnp.bfloat16
    mel = mel_ref[0]                                                # (T, n_mel) f32
    T = mel.shape[0]
    H = w1_ref.shape[1]

    # ---- spectral: Linear -> Mish -> Linear -> Mish ----
    h = jnp.dot(mel.astype(bf16), w1_ref[...], preferred_element_type=f32) + b1_ref[...]
    h = _mish(h)
    h = jnp.dot(h.astype(bf16), w2_ref[...], preferred_element_type=f32) + b2_ref[...]
    h = _mish(h)

    # ---- temporal: two Conv1dGLU blocks ----
    h = _conv1d_glu(h, cw1_ref, cb1_ref[...])
    h = _conv1d_glu(h, cw2_ref, cb2_ref[...])

    # ---- 2-head self-attention with per-head weights (no lane-64 slicing / concat) ----
    residual = h
    x_bf = h.astype(bf16)
    inv_temp = 1.0 / (float(H) ** 0.5)                              # temperature = sqrt(d_model)
    attn_proj = jnp.zeros((T, H), f32)
    for hh in range(N_HEAD):                                        # static unroll, N_HEAD=2
        q = (jnp.dot(x_bf, wq_ref[hh], preferred_element_type=f32) + bq_ref[hh]) * inv_temp
        k = jnp.dot(x_bf, wk_ref[hh], preferred_element_type=f32) + bk_ref[hh]
        v = jnp.dot(x_bf, wv_ref[hh], preferred_element_type=f32) + bv_ref[hh]
        s = jax.lax.dot_general(q.astype(bf16), k.astype(bf16),
                                (((1,), (1,)), ((), ())),
                                preferred_element_type=f32)         # (T, T)
        s = s - jnp.max(s, axis=-1, keepdims=True)
        p = jnp.exp(s)
        p = p * pl.reciprocal(jnp.sum(p, axis=-1, keepdims=True), approx=True)
        head = jnp.dot(p.astype(bf16), v.astype(bf16), preferred_element_type=f32)
        attn_proj = attn_proj + jnp.dot(head.astype(bf16), wo_ref[hh],
                                        preferred_element_type=f32)
    h = attn_proj + bo_ref[...] + residual

    # ---- final Linear + temporal average pool (mask=None path) ----
    y = jnp.dot(h.astype(bf16), wf_ref[...], preferred_element_type=f32) + bf_ref[...]
    o_ref[0] = (jnp.sum(y, axis=0, keepdims=True) * jnp.float32(1.0 / T)).astype(o_ref.dtype)


def _prep_params(p):
    # bf16 weights (halves DMA, MXU-native); f32 biases; per-head splits for Q/K/V/O.
    bf16 = jnp.bfloat16
    H, dk = HIDDEN, D_HEAD

    def heads_in(w):    # (H, n_head*dk) -> (n_head, H, dk)   (column split)
        return jnp.transpose(w.reshape(H, N_HEAD, dk), (1, 0, 2))

    return dict(
        w1=p["w1"].astype(bf16), b1=p["b1"].reshape(1, -1),
        w2=p["w2"].astype(bf16), b2=p["b2"].reshape(1, -1),
        cw1=p["cw1"].astype(bf16), cb1=p["cb1"].reshape(1, -1),
        cw2=p["cw2"].astype(bf16), cb2=p["cb2"].reshape(1, -1),
        wq=heads_in(p["wq"]).astype(bf16), bq=p["bq"].reshape(N_HEAD, 1, dk),
        wk=heads_in(p["wk"]).astype(bf16), bk=p["bk"].reshape(N_HEAD, 1, dk),
        wv=heads_in(p["wv"]).astype(bf16), bv=p["bv"].reshape(N_HEAD, 1, dk),
        wo=p["wo"].reshape(N_HEAD, dk, H).astype(bf16), bo=p["bo"].reshape(1, -1),
        wf=p["wf"].astype(bf16), bf=p["bf"].reshape(1, -1),
    )


def mel_style_encoder(mel, params):
    B, T, F = mel.shape
    H, O, K, dk = HIDDEN, OUT_DIM, KERNEL, D_HEAD
    q = _prep_params(params)

    def c2(shape):
        return pl.BlockSpec(shape, lambda b: (0, 0))

    def c3(shape):
        return pl.BlockSpec(shape, lambda b: (0, 0, 0))

    # NOTE: the ~1 MiB of constant-index-map weights could be single-buffered with
    # pipeline_mode=pl.Buffered(1) to save VMEM on v7x; left at the default double
    # buffering for compile robustness (blocks with unchanged indices are not re-fetched).
    out = pl.pallas_call(
        _mel_style_kernel,
        out_shape=jax.ShapeDtypeStruct((B, 1, O), mel.dtype),
        grid_spec=pltpu.PrefetchScalarGridSpec(
            num_scalar_prefetch=0,
            grid=(B,),                                   # B >= 2 keeps both v7x TCs busy
            in_specs=[
                pl.BlockSpec((1, T, F), lambda b: (b, 0, 0)),      # mel tile
                c2((F, H)), c2((1, H)),                            # spectral W1, b1
                c2((H, H)), c2((1, H)),                            # spectral W2, b2
                c3((K, H, 2 * H)), c2((1, 2 * H)),                 # conv-GLU 1
                c3((K, H, 2 * H)), c2((1, 2 * H)),                 # conv-GLU 2
                c3((N_HEAD, H, dk)), c3((N_HEAD, 1, dk)),          # Wq, bq (per head)
                c3((N_HEAD, H, dk)), c3((N_HEAD, 1, dk)),          # Wk, bk
                c3((N_HEAD, H, dk)), c3((N_HEAD, 1, dk)),          # Wv, bv
                c3((N_HEAD, dk, H)), c2((1, H)),                   # Wo (per head), bo
                c2((H, O)), c2((1, O)),                            # fc
            ],
            out_specs=pl.BlockSpec((1, 1, O), lambda b: (b, 0, 0)),
        ),
        compiler_params=pltpu.CompilerParams(
            dimension_semantics=("parallel",),
            vmem_limit_bytes=VMEM_LIMIT),
    )(mel,
      q["w1"], q["b1"], q["w2"], q["b2"],
      q["cw1"], q["cb1"], q["cw2"], q["cb2"],
      q["wq"], q["bq"], q["wk"], q["bk"], q["wv"], q["bv"],
      q["wo"], q["bo"], q["wf"], q["bf"])
    return out.reshape(B, O)


# ----------------------------------------------------------------------------
# Pure-numpy (float64) reference of the same forward pass
# ----------------------------------------------------------------------------
def _reference_forward_np(mel, p):
    P = {k: np.asarray(v, dtype=np.float64) for k, v in p.items()}
    x = np.asarray(mel, dtype=np.float64)

    def mish(z):
        return z * np.tanh(np.logaddexp(z, 0.0))

    h = mish(x @ P["w1"] + P["b1"])
    h = mish(h @ P["w2"] + P["b2"])
    for wc, bc in ((P["cw1"], P["cb1"]), (P["cw2"], P["cb2"])):
        B, T, H = h.shape
        xp = np.pad(h, ((0, 0), (PAD, PAD), (0, 0)))
        y = np.broadcast_to(bc, (B, T, 2 * H)).copy()
        for k in range(KERNEL):
            y = y + np.einsum("btc,cd->btd", xp[:, k:k + T, :], wc[k])
        val, gate = y[..., :H], y[..., H:]
        h = h + val / (1.0 + np.exp(-gate))
    residual = h
    q = h @ P["wq"] + P["bq"]
    k_ = h @ P["wk"] + P["bk"]
    v = h @ P["wv"] + P["bv"]
    B, T, H = h.shape
    dk = H // N_HEAD

    def heads(z):
        return z.reshape(B, T, N_HEAD, dk).transpose(0, 2, 1, 3)

    qh, kh, vh = heads(q), heads(k_), heads(v)
    attn = np.einsum("bhqd,bhkd->bhqk", qh, kh) / np.sqrt(float(H))
    attn = attn - attn.max(axis=-1, keepdims=True)
    attn = np.exp(attn)
    attn = attn / attn.sum(axis=-1, keepdims=True)
    out = np.einsum("bhqk,bhkd->bhqd", attn, vh)
    out = out.transpose(0, 2, 1, 3).reshape(B, T, H)
    h = out @ P["wo"] + P["bo"] + residual
    y = h @ P["wf"] + P["bf"]
    return y.mean(axis=1)


if __name__ == "__main__":
    B, T = 2, 16   # small demo shapes; channel dims follow module defaults

    key = jax.random.PRNGKey(0)
    ks = jax.random.split(key, 17)

    def nrm(k, shape, scale):
        return scale * jax.random.normal(k, shape, dtype=jnp.float32)

    params = {
        "w1": nrm(ks[0], (N_MEL, HIDDEN), 0.05),
        "b1": nrm(ks[1], (HIDDEN,), 0.01),
        "w2": nrm(ks[2], (HIDDEN, HIDDEN), 0.05),
        "b2": nrm(ks[3], (HIDDEN,), 0.01),
        "cw1": nrm(ks[4], (KERNEL, HIDDEN, 2 * HIDDEN), 0.03),
        "cb1": nrm(ks[5], (2 * HIDDEN,), 0.01),
        "cw2": nrm(ks[6], (KERNEL, HIDDEN, 2 * HIDDEN), 0.03),
        "cb2": nrm(ks[7], (2 * HIDDEN,), 0.01),
        "wq": nrm(ks[8], (HIDDEN, HIDDEN), 0.05),
        "bq": nrm(ks[9], (HIDDEN,), 0.01),
        "wk": nrm(ks[10], (HIDDEN, HIDDEN), 0.05),
        "bk": nrm(ks[11], (HIDDEN,), 0.01),
        "wv": nrm(ks[12], (HIDDEN, HIDDEN), 0.05),
        "bv": nrm(ks[13], (HIDDEN,), 0.01),
        "wo": nrm(ks[14], (HIDDEN, HIDDEN), 0.05),
        "bo": jnp.zeros((HIDDEN,), jnp.float32),
        "wf": nrm(ks[15], (HIDDEN, OUT_DIM), 0.05),
        "bf": jnp.zeros((OUT_DIM,), jnp.float32),
    }
    mel = jax.random.normal(ks[16], (B, T, N_MEL), dtype=jnp.float32)

    forward = jax.jit(mel_style_encoder)
    out = forward(mel, params)
    jax.block_until_ready(out)

    ref = _reference_forward_np(np.asarray(mel), params)
    out_np = np.asarray(out, dtype=np.float64)
    assert out_np.shape == ref.shape, (out_np.shape, ref.shape)
    max_diff = float(np.max(np.abs(out_np - ref)))
    # Tolerance sized for bf16 MXU matmuls (f32 accumulation) vs. the f64 reference.
    assert np.allclose(out_np, ref, atol=5e-3, rtol=5e-2), f"max_abs_diff={max_diff}"

    print("KERNEL_OK")
</pallas_src>

<mosaic_0001>
module attributes {stable_mosaic.version = 11 : i64} {
  func.func @_mel_style_kernel(%arg0: i32, %arg1: memref<1x16x80xf32, #tpu.memory_space<vmem>>, %arg2: memref<80x128xbf16, #tpu.memory_space<vmem>>, %arg3: memref<1x128xf32, #tpu.memory_space<vmem>>, %arg4: memref<128x128xbf16, #tpu.memory_space<vmem>>, %arg5: memref<1x128xf32, #tpu.memory_space<vmem>>, %arg6: memref<5x128x256xbf16, #tpu.memory_space<vmem>>, %arg7: memref<1x256xf32, #tpu.memory_space<vmem>>, %arg8: memref<5x128x256xbf16, #tpu.memory_space<vmem>>, %arg9: memref<1x256xf32, #tpu.memory_space<vmem>>, %arg10: memref<2x128x64xbf16, #tpu.memory_space<vmem>>, %arg11: memref<2x1x64xf32, #tpu.memory_space<vmem>>, %arg12: memref<2x128x64xbf16, #tpu.memory_space<vmem>>, %arg13: memref<2x1x64xf32, #tpu.memory_space<vmem>>, %arg14: memref<2x128x64xbf16, #tpu.memory_space<vmem>>, %arg15: memref<2x1x64xf32, #tpu.memory_space<vmem>>, %arg16: memref<2x64x128xbf16, #tpu.memory_space<vmem>>, %arg17: memref<1x128xf32, #tpu.memory_space<vmem>>, %arg18: memref<128x128xbf16, #tpu.memory_space<vmem>>, %arg19: memref<1x128xf32, #tpu.memory_space<vmem>>, %arg20: memref<1x1x128xf32, #tpu.memory_space<vmem>>) attributes {dimension_semantics = [#tpu.dimension_semantics<parallel>], iteration_bounds = array<i64: 2>, scalar_prefetch = 0 : i64, scratch_operands = 0 : i64, tpu.core_type = #tpu.core_type<tc>, window_params = [{transform_indices = @transform_0, window_bounds = array<i64: 1, 16, 80>}, {pipeline_mode = #tpu.pipeline_mode<synchronous>, transform_indices = @transform_1, window_bounds = array<i64: 80, 128>}, {pipeline_mode = #tpu.pipeline_mode<synchronous>, transform_indices = @transform_2, window_bounds = array<i64: 1, 128>}, {pipeline_mode = #tpu.pipeline_mode<synchronous>, transform_indices = @transform_3, window_bounds = array<i64: 128, 128>}, {pipeline_mode = #tpu.pipeline_mode<synchronous>, transform_indices = @transform_4, window_bounds = array<i64: 1, 128>}, {pipeline_mode = #tpu.pipeline_mode<synchronous>, transform_indices = @transform_5, window_bounds = array<i64: 5, 128, 256>}, {pipeline_mode = #tpu.pipeline_mode<synchronous>, transform_indices = @transform_6, window_bounds = array<i64: 1, 256>}, {pipeline_mode = #tpu.pipeline_mode<synchronous>, transform_indices = @transform_7, window_bounds = array<i64: 5, 128, 256>}, {pipeline_mode = #tpu.pipeline_mode<synchronous>, transform_indices = @transform_8, window_bounds = array<i64: 1, 256>}, {pipeline_mode = #tpu.pipeline_mode<synchronous>, transform_indices = @transform_9, window_bounds = array<i64: 2, 128, 64>}, {pipeline_mode = #tpu.pipeline_mode<synchronous>, transform_indices = @transform_10, window_bounds = array<i64: 2, 1, 64>}, {pipeline_mode = #tpu.pipeline_mode<synchronous>, transform_indices = @transform_11, window_bounds = array<i64: 2, 128, 64>}, {pipeline_mode = #tpu.pipeline_mode<synchronous>, transform_indices = @transform_12, window_bounds = array<i64: 2, 1, 64>}, {pipeline_mode = #tpu.pipeline_mode<synchronous>, transform_indices = @transform_13, window_bounds = array<i64: 2, 128, 64>}, {pipeline_mode = #tpu.pipeline_mode<synchronous>, transform_indices = @transform_14, window_bounds = array<i64: 2, 1, 64>}, {pipeline_mode = #tpu.pipeline_mode<synchronous>, transform_indices = @transform_15, window_bounds = array<i64: 2, 64, 128>}, {pipeline_mode = #tpu.pipeline_mode<synchronous>, transform_indices = @transform_16, window_bounds = array<i64: 1, 128>}, {pipeline_mode = #tpu.pipeline_mode<synchronous>, transform_indices = @transform_17, window_bounds = array<i64: 128, 128>}, {pipeline_mode = #tpu.pipeline_mode<synchronous>, transform_indices = @transform_18, window_bounds = array<i64: 1, 128>}, {transform_indices = @transform_19, window_bounds = array<i64: 1, 1, 128>}]} {
    %c0 = arith.constant 0 : index
    %c0_0 = arith.constant 0 : index
    %c0_1 = arith.constant 0 : index
    %0 = vector.load %arg1[%c0, %c0_0, %c0_1] : memref<1x16x80xf32, #tpu.memory_space<vmem>>, vector<1x16x80xf32>
    %1 = vector.shape_cast %0 : vector<1x16x80xf32> to vector<16x80xf32>
    %2 = arith.truncf %1 : vector<16x80xf32> to vector<16x80xbf16>
    %c0_2 = arith.constant 0 : index
    %c0_3 = arith.constant 0 : index
    %3 = vector.load %arg2[%c0_2, %c0_3] : memref<80x128xbf16, #tpu.memory_space<vmem>>, vector<80x128xbf16>
    %cst = arith.constant dense<0.000000e+00> : vector<16x128xf32>
    %4 = tpu.matmul %2, %3, %cst {dimension_numbers = #tpu.dot_dimension_numbers<[1], [0], [0], [1], [0, 0, 1, 1], [], []>} : vector<16x80xbf16>, vector<80x128xbf16>, vector<16x128xf32> -> vector<16x128xf32>
    %c0_4 = arith.constant 0 : index
    %c0_5 = arith.constant 0 : index
    %5 = vector.load %arg3[%c0_4, %c0_5] : memref<1x128xf32, #tpu.memory_space<vmem>>, vector<1x128xf32>
    %6 = vector.broadcast %5 : vector<1x128xf32> to vector<16x128xf32>
    %7 = arith.addf %4, %6 : vector<16x128xf32>
    %8 = math.absf %7 : vector<16x128xf32>
    %cst_6 = arith.constant 0.000000e+00 : f32
    %9 = vector.broadcast %cst_6 : f32 to vector<16x128xf32>
    %10 = arith.subf %9, %8 : vector<16x128xf32>
    %11 = math.exp %10 : vector<16x128xf32>
    %12 = arith.mulf %11, %11 : vector<16x128xf32>
    %cst_7 = arith.constant 0.000000e+00 : f32
    %13 = vector.broadcast %cst_7 : f32 to vector<16x128xf32>
    %14 = arith.cmpf oge, %7, %13 : vector<16x128xf32>
    %cst_8 = arith.constant 2.000000e+00 : f32
    %15 = vector.broadcast %cst_8 : f32 to vector<16x128xf32>
    %16 = arith.mulf %15, %11 : vector<16x128xf32>
    %cst_9 = arith.constant 1.000000e+00 : f32
    %17 = vector.broadcast %cst_9 : f32 to vector<16x128xf32>
    %18 = arith.addf %17, %16 : vector<16x128xf32>
    %cst_10 = arith.constant 2.000000e+00 : f32
    %19 = vector.broadcast %cst_10 : f32 to vector<16x128xf32>
    %20 = arith.mulf %19, %11 : vector<16x128xf32>
    %21 = arith.addf %20, %12 : vector<16x128xf32>
    %22 = arith.select %14, %18, %21 : vector<16x128xi1>, vector<16x128xf32>
    %cst_11 = arith.constant 2.000000e+00 : f32
    %23 = vector.broadcast %cst_11 : f32 to vector<16x128xf32>
    %24 = arith.mulf %23, %11 : vector<16x128xf32>
    %cst_12 = arith.constant 1.000000e+00 : f32
    %25 = vector.broadcast %cst_12 : f32 to vector<16x128xf32>
    %26 = arith.addf %25, %24 : vector<16x128xf32>
    %cst_13 = arith.constant 2.000000e+00 : f32
    %27 = vector.broadcast %cst_13 : f32 to vector<16x128xf32>
    %28 = arith.mulf %27, %12 : vector<16x128xf32>
    %29 = arith.addf %26, %28 : vector<16x128xf32>
    %cst_14 = arith.constant 2.000000e+00 : f32
    %30 = vector.broadcast %cst_14 : f32 to vector<16x128xf32>
    %31 = arith.mulf %30, %11 : vector<16x128xf32>
    %cst_15 = arith.constant 2.000000e+00 : f32
    %32 = vector.broadcast %cst_15 : f32 to vector<16x128xf32>
    %33 = arith.addf %32, %31 : vector<16x128xf32>
    %34 = arith.addf %33, %12 : vector<16x128xf32>
    %35 = arith.select %14, %29, %34 : vector<16x128xi1>, vector<16x128xf32>
    %36 = arith.mulf %7, %22 : vector<16x128xf32>
    %37 = arith.divf %36, %35 : vector<16x128xf32>
    %38 = arith.truncf %37 : vector<16x128xf32> to vector<16x128xbf16>
    %c0_16 = arith.constant 0 : index
    %c0_17 = arith.constant 0 : index
    %39 = vector.load %arg4[%c0_16, %c0_17] : memref<128x128xbf16, #tpu.memory_space<vmem>>, vector<128x128xbf16>
    %cst_18 = arith.constant dense<0.000000e+00> : vector<16x128xf32>
    %40 = tpu.matmul %38, %39, %cst_18 {dimension_numbers = #tpu.dot_dimension_numbers<[1], [0], [0], [1], [0, 0, 1, 1], [], []>} : vector<16x128xbf16>, vector<128x128xbf16>, vector<16x128xf32> -> vector<16x128xf32>
    %c0_19 = arith.constant 0 : index
    %c0_20 = arith.constant 0 : index
    %41 = vector.load %arg5[%c0_19, %c0_20] : memref<1x128xf32, #tpu.memory_space<vmem>>, vector<1x128xf32>
    %42 = vector.broadcast %41 : vector<1x128xf32> to vector<16x128xf32>
    %43 = arith.addf %40, %42 : vector<16x128xf32>
    %44 = math.absf %43 : vector<16x128xf32>
    %cst_21 = arith.constant 0.000000e+00 : f32
    %45 = vector.broadcast %cst_21 : f32 to vector<16x128xf32>
    %46 = arith.subf %45, %44 : vector<16x128xf32>
    %47 = math.exp %46 : vector<16x128xf32>
    %48 = arith.mulf %47, %47 : vector<16x128xf32>
    %cst_22 = arith.constant 0.000000e+00 : f32
    %49 = vector.broadcast %cst_22 : f32 to vector<16x128xf32>
    %50 = arith.cmpf oge, %43, %49 : vector<16x128xf32>
    %cst_23 = arith.constant 2.000000e+00 : f32
    %51 = vector.broadcast %cst_23 : f32 to vector<16x128xf32>
    %52 = arith.mulf %51, %47 : vector<16x128xf32>
    %cst_24 = arith.constant 1.000000e+00 : f32
    %53 = vector.broadcast %cst_24 : f32 to vector<16x128xf32>
    %54 = arith.addf %53, %52 : vector<16x128xf32>
    %cst_25 = arith.constant 2.000000e+00 : f32
    %55 = vector.broadcast %cst_25 : f32 to vector<16x128xf32>
    %56 = arith.mulf %55, %47 : vector<16x128xf32>
    %57 = arith.addf %56, %48 : vector<16x128xf32>
    %58 = arith.select %50, %54, %57 : vector<16x128xi1>, vector<16x128xf32>
    %cst_26 = arith.constant 2.000000e+00 : f32
    %59 = vector.broadcast %cst_26 : f32 to vector<16x128xf32>
    %60 = arith.mulf %59, %47 : vector<16x128xf32>
    %cst_27 = arith.constant 1.000000e+00 : f32
    %61 = vector.broadcast %cst_27 : f32 to vector<16x128xf32>
    %62 = arith.addf %61, %60 : vector<16x128xf32>
    %cst_28 = arith.constant 2.000000e+00 : f32
    %63 = vector.broadcast %cst_28 : f32 to vector<16x128xf32>
    %64 = arith.mulf %63, %48 : vector<16x128xf32>
    %65 = arith.addf %62, %64 : vector<16x128xf32>
    %cst_29 = arith.constant 2.000000e+00 : f32
    %66 = vector.broadcast %cst_29 : f32 to vector<16x128xf32>
    %67 = arith.mulf %66, %47 : vector<16x128xf32>
    %cst_30 = arith.constant 2.000000e+00 : f32
    %68 = vector.broadcast %cst_30 : f32 to vector<16x128xf32>
    %69 = arith.addf %68, %67 : vector<16x128xf32>
    %70 = arith.addf %69, %48 : vector<16x128xf32>
    %71 = arith.select %50, %65, %70 : vector<16x128xi1>, vector<16x128xf32>
    %72 = arith.mulf %43, %58 : vector<16x128xf32>
    %73 = arith.divf %72, %71 : vector<16x128xf32>
    %c0_31 = arith.constant 0 : index
    %c0_32 = arith.constant 0 : index
    %74 = vector.load %arg7[%c0_31, %c0_32] : memref<1x256xf32, #tpu.memory_space<vmem>>, vector<1x256xf32>
    %cst_33 = arith.constant 0.000000e+00 : f32
    %75 = vector.broadcast %cst_33 : f32 to vector<2x128xf32>
    %76 = tpu.concatenate %75, %73, %75 in 0 : vector<2x128xf32>, vector<16x128xf32>, vector<2x128xf32> -> vector<20x128xf32>
    %77 = vector.extract_strided_slice %76 {offsets = [0, 0], sizes = [16, 128], strides = [1, 1]} : vector<20x128xf32> to vector<16x128xf32>
    %78 = arith.truncf %77 : vector<16x128xf32> to vector<16x128xbf16>
    %c0_34 = arith.constant 0 : index
    %c0_35 = arith.constant 0 : index
    %c0_36 = arith.constant 0 : index
    %79 = vector.load %arg6[%c0_34, %c0_35, %c0_36] : memref<5x128x256xbf16, #tpu.memory_space<vmem>>, vector<1x128x256xbf16>
    %80 = vector.shape_cast %79 : vector<1x128x256xbf16> to vector<128x256xbf16>
    %cst_37 = arith.constant dense<0.000000e+00> : vector<16x256xf32>
    %81 = tpu.matmul %78, %80, %cst_37 {dimension_numbers = #tpu.dot_dimension_numbers<[1], [0], [0], [1], [0, 0, 1, 1], [], []>} : vector<16x128xbf16>, vector<128x256xbf16>, vector<16x256xf32> -> vector<16x256xf32>
    %82 = vector.broadcast %74 : vector<1x256xf32> to vector<16x256xf32>
    %83 = arith.addf %82, %81 : vector<16x256xf32>
    %84 = vector.extract_strided_slice %76 {offsets = [1, 0], sizes = [16, 128], strides = [1, 1]} : vector<20x128xf32> to vector<16x128xf32>
    %85 = arith.truncf %84 : vector<16x128xf32> to vector<16x128xbf16>
    %c1 = arith.constant 1 : index
    %c0_38 = arith.constant 0 : index
    %c0_39 = arith.constant 0 : index
    %86 = vector.load %arg6[%c1, %c0_38, %c0_39] : memref<5x128x256xbf16, #tpu.memory_space<vmem>>, vector<1x128x256xbf16>
    %87 = vector.shape_cast %86 : vector<1x128x256xbf16> to vector<128x256xbf16>
    %cst_40 = arith.constant dense<0.000000e+00> : vector<16x256xf32>
    %88 = tpu.matmul %85, %87, %cst_40 {dimension_numbers = #tpu.dot_dimension_numbers<[1], [0], [0], [1], [0, 0, 1, 1], [], []>} : vector<16x128xbf16>, vector<128x256xbf16>, vector<16x256xf32> -> vector<16x256xf32>
    %89 = arith.addf %83, %88 : vector<16x256xf32>
    %90 = vector.extract_strided_slice %76 {offsets = [2, 0], sizes = [16, 128], strides = [1, 1]} : vector<20x128xf32> to vector<16x128xf32>
    %91 = arith.truncf %90 : vector<16x128xf32> to vector<16x128xbf16>
    %c2 = arith.constant 2 : index
    %c0_41 = arith.constant 0 : index
    %c0_42 = arith.constant 0 : index
    %92 = vector.load %arg6[%c2, %c0_41, %c0_42] : memref<5x128x256xbf16, #tpu.memory_space<vmem>>, vector<1x128x256xbf16>
    %93 = vector.shape_cast %92 : vector<1x128x256xbf16> to vector<128x256xbf16>
    %cst_43 = arith.constant dense<0.000000e+00> : vector<16x256xf32>
    %94 = tpu.matmul %91, %93, %cst_43 {dimension_numbers = #tpu.dot_dimension_numbers<[1], [0], [0], [1], [0, 0, 1, 1], [], []>} : vector<16x128xbf16>, vector<128x256xbf16>, vector<16x256xf32> -> vector<16x256xf32>
    %95 = arith.addf %89, %94 : vector<16x256xf32>
    %96 = vector.extract_strided_slice %76 {offsets = [3, 0], sizes = [16, 128], strides = [1, 1]} : vector<20x128xf32> to vector<16x128xf32>
    %97 = arith.truncf %96 : vector<16x128xf32> to vector<16x128xbf16>
    %c3 = arith.constant 3 : index
    %c0_44 = arith.constant 0 : index
    %c0_45 = arith.constant 0 : index
    %98 = vector.load %arg6[%c3, %c0_44, %c0_45] : memref<5x128x256xbf16, #tpu.memory_space<vmem>>, vector<1x128x256xbf16>
    %99 = vector.shape_cast %98 : vector<1x128x256xbf16> to vector<128x256xbf16>
    %cst_46 = arith.constant dense<0.000000e+00> : vector<16x256xf32>
    %100 = tpu.matmul %97, %99, %cst_46 {dimension_numbers = #tpu.dot_dimension_numbers<[1], [0], [0], [1], [0, 0, 1, 1], [], []>} : vector<16x128xbf16>, vector<128x256xbf16>, vector<16x256xf32> -> vector<16x256xf32>
    %101 = arith.addf %95, %100 : vector<16x256xf32>
    %102 = vector.extract_strided_slice %76 {offsets = [4, 0], sizes = [16, 128], strides = [1, 1]} : vector<20x128xf32> to vector<16x128xf32>
    %103 = arith.truncf %102 : vector<16x128xf32> to vector<16x128xbf16>
    %c4 = arith.constant 4 : index
    %c0_47 = arith.constant 0 : index
    %c0_48 = arith.constant 0 : index
    %104 = vector.load %arg6[%c4, %c0_47, %c0_48] : memref<5x128x256xbf16, #tpu.memory_space<vmem>>, vector<1x128x256xbf16>
    %105 = vector.shape_cast %104 : vector<1x128x256xbf16> to vector<128x256xbf16>
    %cst_49 = arith.constant dense<0.000000e+00> : vector<16x256xf32>
    %106 = tpu.matmul %103, %105, %cst_49 {dimension_numbers = #tpu.dot_dimension_numbers<[1], [0], [0], [1], [0, 0, 1, 1], [], []>} : vector<16x128xbf16>, vector<128x256xbf16>, vector<16x256xf32> -> vector<16x256xf32>
    %107 = arith.addf %101, %106 : vector<16x256xf32>
    %108 = vector.extract_strided_slice %107 {offsets = [0, 0], sizes = [16, 128], strides = [1, 1]} : vector<16x256xf32> to vector<16x128xf32>
    %109 = vector.extract_strided_slice %107 {offsets = [0, 128], sizes = [16, 128], strides = [1, 1]} : vector<16x256xf32> to vector<16x128xf32>
    %110 = math.absf %109 : vector<16x128xf32>
    %cst_50 = arith.constant 0.000000e+00 : f32
    %111 = vector.broadcast %cst_50 : f32 to vector<16x128xf32>
    %112 = arith.subf %111, %110 : vector<16x128xf32>
    %113 = math.exp %112 : vector<16x128xf32>
    %cst_51 = arith.constant 0.000000e+00 : f32
    %114 = vector.broadcast %cst_51 : f32 to vector<16x128xf32>
    %115 = arith.cmpf oge, %109, %114 : vector<16x128xf32>
    %cst_52 = arith.constant 1.000000e+00 : f32
    %116 = vector.broadcast %cst_52 : f32 to vector<16x128xf32>
    %117 = arith.select %115, %116, %113 : vector<16x128xi1>, vector<16x128xf32>
    %cst_53 = arith.constant 1.000000e+00 : f32
    %118 = vector.broadcast %cst_53 : f32 to vector<16x128xf32>
    %119 = arith.addf %118, %113 : vector<16x128xf32>
    %120 = arith.divf %117, %119 : vector<16x128xf32>
    %121 = arith.mulf %108, %120 : vector<16x128xf32>
    %122 = arith.addf %73, %121 : vector<16x128xf32>
    %c0_54 = arith.constant 0 : index
    %c0_55 = arith.constant 0 : index
    %123 = vector.load %arg9[%c0_54, %c0_55] : memref<1x256xf32, #tpu.memory_space<vmem>>, vector<1x256xf32>
    %cst_56 = arith.constant 0.000000e+00 : f32
    %124 = vector.broadcast %cst_56 : f32 to vector<2x128xf32>
    %125 = tpu.concatenate %124, %122, %124 in 0 : vector<2x128xf32>, vector<16x128xf32>, vector<2x128xf32> -> vector<20x128xf32>
    %126 = vector.extract_strided_slice %125 {offsets = [0, 0], sizes = [16, 128], strides = [1, 1]} : vector<20x128xf32> to vector<16x128xf32>
    %127 = arith.truncf %126 : vector<16x128xf32> to vector<16x128xbf16>
    %c0_57 = arith.constant 0 : index
    %c0_58 = arith.constant 0 : index
    %c0_59 = arith.constant 0 : index
    %128 = vector.load %arg8[%c0_57, %c0_58, %c0_59] : memref<5x128x256xbf16, #tpu.memory_space<vmem>>, vector<1x128x256xbf16>
    %129 = vector.shape_cast %128 : vector<1x128x256xbf16> to vector<128x256xbf16>
    %cst_60 = arith.constant dense<0.000000e+00> : vector<16x256xf32>
    %130 = tpu.matmul %127, %129, %cst_60 {dimension_numbers = #tpu.dot_dimension_numbers<[1], [0], [0], [1], [0, 0, 1, 1], [], []>} : vector<16x128xbf16>, vector<128x256xbf16>, vector<16x256xf32> -> vector<16x256xf32>
    %131 = vector.broadcast %123 : vector<1x256xf32> to vector<16x256xf32>
    %132 = arith.addf %131, %130 : vector<16x256xf32>
    %133 = vector.extract_strided_slice %125 {offsets = [1, 0], sizes = [16, 128], strides = [1, 1]} : vector<20x128xf32> to vector<16x128xf32>
    %134 = arith.truncf %133 : vector<16x128xf32> to vector<16x128xbf16>
    %c1_61 = arith.constant 1 : index
    %c0_62 = arith.constant 0 : index
    %c0_63 = arith.constant 0 : index
    %135 = vector.load %arg8[%c1_61, %c0_62, %c0_63] : memref<5x128x256xbf16, #tpu.memory_space<vmem>>, vector<1x128x256xbf16>
    %136 = vector.shape_cast %135 : vector<1x128x256xbf16> to vector<128x256xbf16>
    %cst_64 = arith.constant dense<0.000000e+00> : vector<16x256xf32>
    %137 = tpu.matmul %134, %136, %cst_64 {dimension_numbers = #tpu.dot_dimension_numbers<[1], [0], [0], [1], [0, 0, 1, 1], [], []>} : vector<16x128xbf16>, vector<128x256xbf16>, vector<16x256xf32> -> vector<16x256xf32>
    %138 = arith.addf %132, %137 : vector<16x256xf32>
    %139 = vector.extract_strided_slice %125 {offsets = [2, 0], sizes = [16, 128], strides = [1, 1]} : vector<20x128xf32> to vector<16x128xf32>
    %140 = arith.truncf %139 : vector<16x128xf32> to vector<16x128xbf16>
    %c2_65 = arith.constant 2 : index
    %c0_66 = arith.constant 0 : index
    %c0_67 = arith.constant 0 : index
    %141 = vector.load %arg8[%c2_65, %c0_66, %c0_67] : memref<5x128x256xbf16, #tpu.memory_space<vmem>>, vector<1x128x256xbf16>
    %142 = vector.shape_cast %141 : vector<1x128x256xbf16> to vector<128x256xbf16>
    %cst_68 = arith.constant dense<0.000000e+00> : vector<16x256xf32>
    %143 = tpu.matmul %140, %142, %cst_68 {dimension_numbers = #tpu.dot_dimension_numbers<[1], [0], [0], [1], [0, 0, 1, 1], [], []>} : vector<16x128xbf16>, vector<128x256xbf16>, vector<16x256xf32> -> vector<16x256xf32>
    %144 = arith.addf %138, %143 : vector<16x256xf32>
    %145 = vector.extract_strided_slice %125 {offsets = [3, 0], sizes = [16, 128], strides = [1, 1]} : vector<20x128xf32> to vector<16x128xf32>
    %146 = arith.truncf %145 : vector<16x128xf32> to vector<16x128xbf16>
    %c3_69 = arith.constant 3 : index
    %c0_70 = arith.constant 0 : index
    %c0_71 = arith.constant 0 : index
    %147 = vector.load %arg8[%c3_69, %c0_70, %c0_71] : memref<5x128x256xbf16, #tpu.memory_space<vmem>>, vector<1x128x256xbf16>
    %148 = vector.shape_cast %147 : vector<1x128x256xbf16> to vector<128x256xbf16>
    %cst_72 = arith.constant dense<0.000000e+00> : vector<16x256xf32>
    %149 = tpu.matmul %146, %148, %cst_72 {dimension_numbers = #tpu.dot_dimension_numbers<[1], [0], [0], [1], [0, 0, 1, 1], [], []>} : vector<16x128xbf16>, vector<128x256xbf16>, vector<16x256xf32> -> vector<16x256xf32>
    %150 = arith.addf %144, %149 : vector<16x256xf32>
    %151 = vector.extract_strided_slice %125 {offsets = [4, 0], sizes = [16, 128], strides = [1, 1]} : vector<20x128xf32> to vector<16x128xf32>
    %152 = arith.truncf %151 : vector<16x128xf32> to vector<16x128xbf16>
    %c4_73 = arith.constant 4 : index
    %c0_74 = arith.constant 0 : index
    %c0_75 = arith.constant 0 : index
    %153 = vector.load %arg8[%c4_73, %c0_74, %c0_75] : memref<5x128x256xbf16, #tpu.memory_space<vmem>>, vector<1x128x256xbf16>
    %154 = vector.shape_cast %153 : vector<1x128x256xbf16> to vector<128x256xbf16>
    %cst_76 = arith.constant dense<0.000000e+00> : vector<16x256xf32>
    %155 = tpu.matmul %152, %154, %cst_76 {dimension_numbers = #tpu.dot_dimension_numbers<[1], [0], [0], [1], [0, 0, 1, 1], [], []>} : vector<16x128xbf16>, vector<128x256xbf16>, vector<16x256xf32> -> vector<16x256xf32>
    %156 = arith.addf %150, %155 : vector<16x256xf32>
    %157 = vector.extract_strided_slice %156 {offsets = [0, 0], sizes = [16, 128], strides = [1, 1]} : vector<16x256xf32> to vector<16x128xf32>
    %158 = vector.extract_strided_slice %156 {offsets = [0, 128], sizes = [16, 128], strides = [1, 1]} : vector<16x256xf32> to vector<16x128xf32>
    %159 = math.absf %158 : vector<16x128xf32>
    %cst_77 = arith.constant 0.000000e+00 : f32
    %160 = vector.broadcast %cst_77 : f32 to vector<16x128xf32>
    %161 = arith.subf %160, %159 : vector<16x128xf32>
    %162 = math.exp %161 : vector<16x128xf32>
    %cst_78 = arith.constant 0.000000e+00 : f32
    %163 = vector.broadcast %cst_78 : f32 to vector<16x128xf32>
    %164 = arith.cmpf oge, %158, %163 : vector<16x128xf32>
    %cst_79 = arith.constant 1.000000e+00 : f32
    %165 = vector.broadcast %cst_79 : f32 to vector<16x128xf32>
    %166 = arith.select %164, %165, %162 : vector<16x128xi1>, vector<16x128xf32>
    %cst_80 = arith.constant 1.000000e+00 : f32
    %167 = vector.broadcast %cst_80 : f32 to vector<16x128xf32>
    %168 = arith.addf %167, %162 : vector<16x128xf32>
    %169 = arith.divf %166, %168 : vector<16x128xf32>
    %170 = arith.mulf %157, %169 : vector<16x128xf32>
    %171 = arith.addf %122, %170 : vector<16x128xf32>
    %172 = arith.truncf %171 : vector<16x128xf32> to vector<16x128xbf16>
    %cst_81 = arith.constant 0.000000e+00 : f32
    %173 = vector.broadcast %cst_81 : f32 to vector<16x128xf32>
    %c0_82 = arith.constant 0 : index
    %c0_83 = arith.constant 0 : index
    %c0_84 = arith.constant 0 : index
    %174 = vector.load %arg10[%c0_82, %c0_83, %c0_84] : memref<2x128x64xbf16, #tpu.memory_space<vmem>>, vector<1x128x64xbf16>
    %175 = vector.shape_cast %174 : vector<1x128x64xbf16> to vector<128x64xbf16>
    %cst_85 = arith.constant dense<0.000000e+00> : vector<16x64xf32>
    %176 = tpu.matmul %172, %175, %cst_85 {dimension_numbers = #tpu.dot_dimension_numbers<[1], [0], [0], [1], [0, 0, 1, 1], [], []>} : vector<16x128xbf16>, vector<128x64xbf16>, vector<16x64xf32> -> vector<16x64xf32>
    %c0_86 = arith.constant 0 : index
    %c0_87 = arith.constant 0 : index
    %c0_88 = arith.constant 0 : index
    %177 = vector.load %arg11[%c0_86, %c0_87, %c0_88] : memref<2x1x64xf32, #tpu.memory_space<vmem>>, vector<1x1x64xf32>
    %178 = vector.shape_cast %177 : vector<1x1x64xf32> to vector<1x64xf32>
    %179 = vector.broadcast %178 : vector<1x64xf32> to vector<16x64xf32>
    %180 = arith.addf %176, %179 : vector<16x64xf32>
    %cst_89 = arith.constant 0.0883883461 : f32
    %181 = vector.broadcast %cst_89 : f32 to vector<16x64xf32>
    %182 = arith.mulf %180, %181 : vector<16x64xf32>
    %c0_90 = arith.constant 0 : index
    %c0_91 = arith.constant 0 : index
    %c0_92 = arith.constant 0 : index
    %183 = vector.load %arg12[%c0_90, %c0_91, %c0_92] : memref<2x128x64xbf16, #tpu.memory_space<vmem>>, vector<1x128x64xbf16>
    %184 = vector.shape_cast %183 : vector<1x128x64xbf16> to vector<128x64xbf16>
    %cst_93 = arith.constant dense<0.000000e+00> : vector<16x64xf32>
    %185 = tpu.matmul %172, %184, %cst_93 {dimension_numbers = #tpu.dot_dimension_numbers<[1], [0], [0], [1], [0, 0, 1, 1], [], []>} : vector<16x128xbf16>, vector<128x64xbf16>, vector<16x64xf32> -> vector<16x64xf32>
    %c0_94 = arith.constant 0 : index
    %c0_95 = arith.constant 0 : index
    %c0_96 = arith.constant 0 : index
    %186 = vector.load %arg13[%c0_94, %c0_95, %c0_96] : memref<2x1x64xf32, #tpu.memory_space<vmem>>, vector<1x1x64xf32>
    %187 = vector.shape_cast %186 : vector<1x1x64xf32> to vector<1x64xf32>
    %188 = vector.broadcast %187 : vector<1x64xf32> to vector<16x64xf32>
    %189 = arith.addf %185, %188 : vector<16x64xf32>
    %c0_97 = arith.constant 0 : index
    %c0_98 = arith.constant 0 : index
    %c0_99 = arith.constant 0 : index
    %190 = vector.load %arg14[%c0_97, %c0_98, %c0_99] : memref<2x128x64xbf16, #tpu.memory_space<vmem>>, vector<1x128x64xbf16>
    %191 = vector.shape_cast %190 : vector<1x128x64xbf16> to vector<128x64xbf16>
    %cst_100 = arith.constant dense<0.000000e+00> : vector<16x64xf32>
    %192 = tpu.matmul %172, %191, %cst_100 {dimension_numbers = #tpu.dot_dimension_numbers<[1], [0], [0], [1], [0, 0, 1, 1], [], []>} : vector<16x128xbf16>, vector<128x64xbf16>, vector<16x64xf32> -> vector<16x64xf32>
    %c0_101 = arith.constant 0 : index
    %c0_102 = arith.constant 0 : index
    %c0_103 = arith.constant 0 : index
    %193 = vector.load %arg15[%c0_101, %c0_102, %c0_103] : memref<2x1x64xf32, #tpu.memory_space<vmem>>, vector<1x1x64xf32>
    %194 = vector.shape_cast %193 : vector<1x1x64xf32> to vector<1x64xf32>
    %195 = vector.broadcast %194 : vector<1x64xf32> to vector<16x64xf32>
    %196 = arith.addf %192, %195 : vector<16x64xf32>
    %197 = arith.truncf %182 : vector<16x64xf32> to vector<16x64xbf16>
    %198 = arith.truncf %189 : vector<16x64xf32> to vector<16x64xbf16>
    %cst_104 = arith.constant dense<0.000000e+00> : vector<16x16xf32>
    %199 = tpu.matmul %197, %198, %cst_104 {dimension_numbers = #tpu.dot_dimension_numbers<[1], [1], [0], [0], [0, 0, 1, 0], [], []>} : vector<16x64xbf16>, vector<16x64xbf16>, vector<16x16xf32> -> vector<16x16xf32>
    %cst_105 = arith.constant dense<0xFF800000> : vector<16xf32>
    %200 = vector.multi_reduction <maximumf>, %199, %cst_105 [1] : vector<16x16xf32> to vector<16xf32>
    %201 = vector.shape_cast %200 : vector<16xf32> to vector<16x1xf32>
    %202 = vector.broadcast %201 : vector<16x1xf32> to vector<16x16xf32>
    %203 = arith.subf %199, %202 : vector<16x16xf32>
    %204 = math.exp %203 : vector<16x16xf32>
    %cst_106 = arith.constant dense<0.000000e+00> : vector<16xf32>
    %205 = vector.multi_reduction <add>, %204, %cst_106 [1] : vector<16x16xf32> to vector<16xf32>
    %206 = vector.shape_cast %205 : vector<16xf32> to vector<16x1xf32>
    %207 = tpu.reciprocal %206 {approx = true} : vector<16x1xf32> -> vector<16x1xf32>
    %208 = vector.broadcast %207 : vector<16x1xf32> to vector<16x16xf32>
    %209 = arith.mulf %204, %208 : vector<16x16xf32>
    %210 = arith.truncf %209 : vector<16x16xf32> to vector<16x16xbf16>
    %211 = arith.truncf %196 : vector<16x64xf32> to vector<16x64xbf16>
    %cst_107 = arith.constant dense<0.000000e+00> : vector<16x64xf32>
    %212 = tpu.matmul %210, %211, %cst_107 {dimension_numbers = #tpu.dot_dimension_numbers<[1], [0], [0], [1], [0, 0, 1, 1], [], []>} : vector<16x16xbf16>, vector<16x64xbf16>, vector<16x64xf32> -> vector<16x64xf32>
    %213 = arith.truncf %212 : vector<16x64xf32> to vector<16x64xbf16>
    %c0_108 = arith.constant 0 : index
    %c0_109 = arith.constant 0 : index
    %c0_110 = arith.constant 0 : index
    %214 = vector.load %arg16[%c0_108, %c0_109, %c0_110] : memref<2x64x128xbf16, #tpu.memory_space<vmem>>, vector<1x64x128xbf16>
    %215 = vector.shape_cast %214 : vector<1x64x128xbf16> to vector<64x128xbf16>
    %cst_111 = arith.constant dense<0.000000e+00> : vector<16x128xf32>
    %216 = tpu.matmul %213, %215, %cst_111 {dimension_numbers = #tpu.dot_dimension_numbers<[1], [0], [0], [1], [0, 0, 1, 1], [], []>} : vector<16x64xbf16>, vector<64x128xbf16>, vector<16x128xf32> -> vector<16x128xf32>
    %217 = arith.addf %173, %216 : vector<16x128xf32>
    %c1_112 = arith.constant 1 : index
    %c0_113 = arith.constant 0 : index
    %c0_114 = arith.constant 0 : index
    %218 = vector.load %arg10[%c1_112, %c0_113, %c0_114] : memref<2x128x64xbf16, #tpu.memory_space<vmem>>, vector<1x128x64xbf16>
    %219 = vector.shape_cast %218 : vector<1x128x64xbf16> to vector<128x64xbf16>
    %cst_115 = arith.constant dense<0.000000e+00> : vector<16x64xf32>
    %220 = tpu.matmul %172, %219, %cst_115 {dimension_numbers = #tpu.dot_dimension_numbers<[1], [0], [0], [1], [0, 0, 1, 1], [], []>} : vector<16x128xbf16>, vector<128x64xbf16>, vector<16x64xf32> -> vector<16x64xf32>
    %c1_116 = arith.constant 1 : index
    %c0_117 = arith.constant 0 : index
    %c0_118 = arith.constant 0 : index
    %221 = vector.load %arg11[%c1_116, %c0_117, %c0_118] : memref<2x1x64xf32, #tpu.memory_space<vmem>>, vector<1x1x64xf32>
    %222 = vector.shape_cast %221 : vector<1x1x64xf32> to vector<1x64xf32>
    %223 = vector.broadcast %222 : vector<1x64xf32> to vector<16x64xf32>
    %224 = arith.addf %220, %223 : vector<16x64xf32>
    %cst_119 = arith.constant 0.0883883461 : f32
    %225 = vector.broadcast %cst_119 : f32 to vector<16x64xf32>
    %226 = arith.mulf %224, %225 : vector<16x64xf32>
    %c1_120 = arith.constant 1 : index
    %c0_121 = arith.constant 0 : index
    %c0_122 = arith.constant 0 : index
    %227 = vector.load %arg12[%c1_120, %c0_121, %c0_122] : memref<2x128x64xbf16, #tpu.memory_space<vmem>>, vector<1x128x64xbf16>
    %228 = vector.shape_cast %227 : vector<1x128x64xbf16> to vector<128x64xbf16>
    %cst_123 = arith.constant dense<0.000000e+00> : vector<16x64xf32>
    %229 = tpu.matmul %172, %228, %cst_123 {dimension_numbers = #tpu.dot_dimension_numbers<[1], [0], [0], [1], [0, 0, 1, 1], [], []>} : vector<16x128xbf16>, vector<128x64xbf16>, vector<16x64xf32> -> vector<16x64xf32>
    %c1_124 = arith.constant 1 : index
    %c0_125 = arith.constant 0 : index
    %c0_126 = arith.constant 0 : index
    %230 = vector.load %arg13[%c1_124, %c0_125, %c0_126] : memref<2x1x64xf32, #tpu.memory_space<vmem>>, vector<1x1x64xf32>
    %231 = vector.shape_cast %230 : vector<1x1x64xf32> to vector<1x64xf32>
    %232 = vector.broadcast %231 : vector<1x64xf32> to vector<16x64xf32>
    %233 = arith.addf %229, %232 : vector<16x64xf32>
    %c1_127 = arith.constant 1 : index
    %c0_128 = arith.constant 0 : index
    %c0_129 = arith.constant 0 : index
    %234 = vector.load %arg14[%c1_127, %c0_128, %c0_129] : memref<2x128x64xbf16, #tpu.memory_space<vmem>>, vector<1x128x64xbf16>
    %235 = vector.shape_cast %234 : vector<1x128x64xbf16> to vector<128x64xbf16>
    %cst_130 = arith.constant dense<0.000000e+00> : vector<16x64xf32>
    %236 = tpu.matmul %172, %235, %cst_130 {dimension_numbers = #tpu.dot_dimension_numbers<[1], [0], [0], [1], [0, 0, 1, 1], [], []>} : vector<16x128xbf16>, vector<128x64xbf16>, vector<16x64xf32> -> vector<16x64xf32>
    %c1_131 = arith.constant 1 : index
    %c0_132 = arith.constant 0 : index
    %c0_133 = arith.constant 0 : index
    %237 = vector.load %arg15[%c1_131, %c0_132, %c0_133] : memref<2x1x64xf32, #tpu.memory_space<vmem>>, vector<1x1x64xf32>
    %238 = vector.shape_cast %237 : vector<1x1x64xf32> to vector<1x64xf32>
    %239 = vector.broadcast %238 : vector<1x64xf32> to vector<16x64xf32>
    %240 = arith.addf %236, %239 : vector<16x64xf32>
    %241 = arith.truncf %226 : vector<16x64xf32> to vector<16x64xbf16>
    %242 = arith.truncf %233 : vector<16x64xf32> to vector<16x64xbf16>
    %cst_134 = arith.constant dense<0.000000e+00> : vector<16x16xf32>
    %243 = tpu.matmul %241, %242, %cst_134 {dimension_numbers = #tpu.dot_dimension_numbers<[1], [1], [0], [0], [0, 0, 1, 0], [], []>} : vector<16x64xbf16>, vector<16x64xbf16>, vector<16x16xf32> -> vector<16x16xf32>
    %cst_135 = arith.constant dense<0xFF800000> : vector<16xf32>
    %244 = vector.multi_reduction <maximumf>, %243, %cst_135 [1] : vector<16x16xf32> to vector<16xf32>
    %245 = vector.shape_cast %244 : vector<16xf32> to vector<16x1xf32>
    %246 = vector.broadcast %245 : vector<16x1xf32> to vector<16x16xf32>
    %247 = arith.subf %243, %246 : vector<16x16xf32>
    %248 = math.exp %247 : vector<16x16xf32>
    %cst_136 = arith.constant dense<0.000000e+00> : vector<16xf32>
    %249 = vector.multi_reduction <add>, %248, %cst_136 [1] : vector<16x16xf32> to vector<16xf32>
    %250 = vector.shape_cast %249 : vector<16xf32> to vector<16x1xf32>
    %251 = tpu.reciprocal %250 {approx = true} : vector<16x1xf32> -> vector<16x1xf32>
    %252 = vector.broadcast %251 : vector<16x1xf32> to vector<16x16xf32>
    %253 = arith.mulf %248, %252 : vector<16x16xf32>
    %254 = arith.truncf %253 : vector<16x16xf32> to vector<16x16xbf16>
    %255 = arith.truncf %240 : vector<16x64xf32> to vector<16x64xbf16>
    %cst_137 = arith.constant dense<0.000000e+00> : vector<16x64xf32>
    %256 = tpu.matmul %254, %255, %cst_137 {dimension_numbers = #tpu.dot_dimension_numbers<[1], [0], [0], [1], [0, 0, 1, 1], [], []>} : vector<16x16xbf16>, vector<16x64xbf16>, vector<16x64xf32> -> vector<16x64xf32>
    %257 = arith.truncf %256 : vector<16x64xf32> to vector<16x64xbf16>
    %c1_138 = arith.constant 1 : index
    %c0_139 = arith.constant 0 : index
    %c0_140 = arith.constant 0 : index
    %258 = vector.load %arg16[%c1_138, %c0_139, %c0_140] : memref<2x64x128xbf16, #tpu.memory_space<vmem>>, vector<1x64x128xbf16>
    %259 = vector.shape_cast %258 : vector<1x64x128xbf16> to vector<64x128xbf16>
    %cst_141 = arith.constant dense<0.000000e+00> : vector<16x128xf32>
    %260 = tpu.matmul %257, %259, %cst_141 {dimension_numbers = #tpu.dot_dimension_numbers<[1], [0], [0], [1], [0, 0, 1, 1], [], []>} : vector<16x64xbf16>, vector<64x128xbf16>, vector<16x128xf32> -> vector<16x128xf32>
    %261 = arith.addf %217, %260 : vector<16x128xf32>
    %c0_142 = arith.constant 0 : index
    %c0_143 = arith.constant 0 : index
    %262 = vector.load %arg17[%c0_142, %c0_143] : memref<1x128xf32, #tpu.memory_space<vmem>>, vector<1x128xf32>
    %263 = vector.broadcast %262 : vector<1x128xf32> to vector<16x128xf32>
    %264 = arith.addf %261, %263 : vector<16x128xf32>
    %265 = arith.addf %264, %171 : vector<16x128xf32>
    %266 = arith.truncf %265 : vector<16x128xf32> to vector<16x128xbf16>
    %c0_144 = arith.constant 0 : index
    %c0_145 = arith.constant 0 : index
    %267 = vector.load %arg18[%c0_144, %c0_145] : memref<128x128xbf16, #tpu.memory_space<vmem>>, vector<128x128xbf16>
    %cst_146 = arith.constant dense<0.000000e+00> : vector<16x128xf32>
    %268 = tpu.matmul %266, %267, %cst_146 {dimension_numbers = #tpu.dot_dimension_numbers<[1], [0], [0], [1], [0, 0, 1, 1], [], []>} : vector<16x128xbf16>, vector<128x128xbf16>, vector<16x128xf32> -> vector<16x128xf32>
    %c0_147 = arith.constant 0 : index
    %c0_148 = arith.constant 0 : index
    %269 = vector.load %arg19[%c0_147, %c0_148] : memref<1x128xf32, #tpu.memory_space<vmem>>, vector<1x128xf32>
    %270 = vector.broadcast %269 : vector<1x128xf32> to vector<16x128xf32>
    %271 = arith.addf %268, %270 : vector<16x128xf32>
    %cst_149 = arith.constant dense<0.000000e+00> : vector<128xf32>
    %272 = vector.multi_reduction <add>, %271, %cst_149 [0] : vector<16x128xf32> to vector<128xf32>
    %273 = vector.shape_cast %272 : vector<128xf32> to vector<1x128xf32>
    %cst_150 = arith.constant 6.250000e-02 : f32
    %274 = vector.broadcast %cst_150 : f32 to vector<1x128xf32>
    %275 = arith.mulf %273, %274 : vector<1x128xf32>
    %c0_151 = arith.constant 0 : index
    %c0_152 = arith.constant 0 : index
    %c0_153 = arith.constant 0 : index
    %276 = vector.load %arg20[%c0_151, %c0_152, %c0_153] : memref<1x1x128xf32, #tpu.memory_space<vmem>>, vector<1x1x128xf32>
    %277 = vector.shape_cast %276 : vector<1x1x128xf32> to vector<1x128xf32>
    %278 = vector.shape_cast %275 : vector<1x128xf32> to vector<1x1x128xf32>
    tpu.vector_store %arg20[%c0_151, %c0_152, %c0_153], %278 {strides = array<i32>} : memref<1x1x128xf32, #tpu.memory_space<vmem>>, vector<1x1x128xf32>,
    return
  }
  func.func @transform_0(%arg0: i32) -> (i32, i32, i32) {
    %c0_i32 = arith.constant 0 : i32
    %c0_i32_0 = arith.constant 0 : i32
    %c0_i32_1 = arith.constant 0 : i32
    return %arg0, %c0_i32, %c0_i32_0 : i32, i32, i32
  }
  func.func @transform_1(%arg0: i32) -> (i32, i32) {
    %c0_i32 = arith.constant 0 : i32
    %c0_i32_0 = arith.constant 0 : i32
    %c0_i32_1 = arith.constant 0 : i32
    return %c0_i32, %c0_i32_0 : i32, i32
  }
  func.func @transform_2(%arg0: i32) -> (i32, i32) {
    %c0_i32 = arith.constant 0 : i32
    %c0_i32_0 = arith.constant 0 : i32
    %c0_i32_1 = arith.constant 0 : i32
    return %c0_i32, %c0_i32_0 : i32, i32
  }
  func.func @transform_3(%arg0: i32) -> (i32, i32) {
    %c0_i32 = arith.constant 0 : i32
    %c0_i32_0 = arith.constant 0 : i32
    %c0_i32_1 = arith.constant 0 : i32
    return %c0_i32, %c0_i32_0 : i32, i32
  }
  func.func @transform_4(%arg0: i32) -> (i32, i32) {
    %c0_i32 = arith.constant 0 : i32
    %c0_i32_0 = arith.constant 0 : i32
    %c0_i32_1 = arith.constant 0 : i32
    return %c0_i32, %c0_i32_0 : i32, i32
  }
  func.func @transform_5(%arg0: i32) -> (i32, i32, i32) {
    %c0_i32 = arith.constant 0 : i32
    %c0_i32_0 = arith.constant 0 : i32
    %c0_i32_1 = arith.constant 0 : i32
    %c0_i32_2 = arith.constant 0 : i32
    return %c0_i32, %c0_i32_0, %c0_i32_1 : i32, i32, i32
  }
  func.func @transform_6(%arg0: i32) -> (i32, i32) {
    %c0_i32 = arith.constant 0 : i32
    %c0_i32_0 = arith.constant 0 : i32
    %c0_i32_1 = arith.constant 0 : i32
    return %c0_i32, %c0_i32_0 : i32, i32
  }
  func.func @transform_7(%arg0: i32) -> (i32, i32, i32) {
    %c0_i32 = arith.constant 0 : i32
    %c0_i32_0 = arith.constant 0 : i32
    %c0_i32_1 = arith.constant 0 : i32
    %c0_i32_2 = arith.constant 0 : i32
    return %c0_i32, %c0_i32_0, %c0_i32_1 : i32, i32, i32
  }
  func.func @transform_8(%arg0: i32) -> (i32, i32) {
    %c0_i32 = arith.constant 0 : i32
    %c0_i32_0 = arith.constant 0 : i32
    %c0_i32_1 = arith.constant 0 : i32
    return %c0_i32, %c0_i32_0 : i32, i32
  }
  func.func @transform_9(%arg0: i32) -> (i32, i32, i32) {
    %c0_i32 = arith.constant 0 : i32
    %c0_i32_0 = arith.constant 0 : i32
    %c0_i32_1 = arith.constant 0 : i32
    %c0_i32_2 = arith.constant 0 : i32
    return %c0_i32, %c0_i32_0, %c0_i32_1 : i32, i32, i32
  }
  func.func @transform_10(%arg0: i32) -> (i32, i32, i32) {
    %c0_i32 = arith.constant 0 : i32
    %c0_i32_0 = arith.constant 0 : i32
    %c0_i32_1 = arith.constant 0 : i32
    %c0_i32_2 = arith.constant 0 : i32
    return %c0_i32, %c0_i32_0, %c0_i32_1 : i32, i32, i32
  }
  func.func @transform_11(%arg0: i32) -> (i32, i32, i32) {
    %c0_i32 = arith.constant 0 : i32
    %c0_i32_0 = arith.constant 0 : i32
    %c0_i32_1 = arith.constant 0 : i32
    %c0_i32_2 = arith.constant 0 : i32
    return %c0_i32, %c0_i32_0, %c0_i32_1 : i32, i32, i32
  }
  func.func @transform_12(%arg0: i32) -> (i32, i32, i32) {
    %c0_i32 = arith.constant 0 : i32
    %c0_i32_0 = arith.constant 0 : i32
    %c0_i32_1 = arith.constant 0 : i32
    %c0_i32_2 = arith.constant 0 : i32
    return %c0_i32, %c0_i32_0, %c0_i32_1 : i32, i32, i32
  }
  func.func @transform_13(%arg0: i32) -> (i32, i32, i32) {
    %c0_i32 = arith.constant 0 : i32
    %c0_i32_0 = arith.constant 0 : i32
    %c0_i32_1 = arith.constant 0 : i32
    %c0_i32_2 = arith.constant 0 : i32
    return %c0_i32, %c0_i32_0, %c0_i32_1 : i32, i32, i32
  }
  func.func @transform_14(%arg0: i32) -> (i32, i32, i32) {
    %c0_i32 = arith.constant 0 : i32
    %c0_i32_0 = arith.constant 0 : i32
    %c0_i32_1 = arith.constant 0 : i32
    %c0_i32_2 = arith.constant 0 : i32
    return %c0_i32, %c0_i32_0, %c0_i32_1 : i32, i32, i32
  }
  func.func @transform_15(%arg0: i32) -> (i32, i32, i32) {
    %c0_i32 = arith.constant 0 : i32
    %c0_i32_0 = arith.constant 0 : i32
    %c0_i32_1 = arith.constant 0 : i32
    %c0_i32_2 = arith.constant 0 : i32
    return %c0_i32, %c0_i32_0, %c0_i32_1 : i32, i32, i32
  }
  func.func @transform_16(%arg0: i32) -> (i32, i32) {
    %c0_i32 = arith.constant 0 : i32
    %c0_i32_0 = arith.constant 0 : i32
    %c0_i32_1 = arith.constant 0 : i32
    return %c0_i32, %c0_i32_0 : i32, i32
  }
  func.func @transform_17(%arg0: i32) -> (i32, i32) {
    %c0_i32 = arith.constant 0 : i32
    %c0_i32_0 = arith.constant 0 : i32
    %c0_i32_1 = arith.constant 0 : i32
    return %c0_i32, %c0_i32_0 : i32, i32
  }
  func.func @transform_18(%arg0: i32) -> (i32, i32) {
    %c0_i32 = arith.constant 0 : i32
    %c0_i32_0 = arith.constant 0 : i32
    %c0_i32_1 = arith.constant 0 : i32
    return %c0_i32, %c0_i32_0 : i32, i32
  }
  func.func @transform_19(%arg0: i32) -> (i32, i32, i32) {
    %c0_i32 = arith.constant 0 : i32
    %c0_i32_0 = arith.constant 0 : i32
    %c0_i32_1 = arith.constant 0 : i32
    return %arg0, %c0_i32, %c0_i32_0 : i32, i32, i32
  }
}

</mosaic_0001>

<bundles_post_ra>
// kernel: mel_style_encoder.1
= control target key start
LH: loop header
LB: loop body
LE: loop exit
PB: predicated region body
PF: predicated region fallthrough
CT: control target
= control target key end

     0   :  { %s6271_s0 = inlined_call_operand.vmem [shape: f32[2,16,80], index: 0, kind: input, shape index: {}]   ;;  %s6272_s1 = inlined_call_operand.vmem [shape: bf16[80,128], index: 1, kind: input, shape index: {}]   ;;  %s6273_s2 = inlined_call_operand.vmem [shape: f32[1,128], index: 2, kind: input, shape index: {}]   ;;  %s6274_s3 = inlined_call_operand.vmem [shape: bf16[128,128], index: 3, kind: input, shape index: {}]   ;;  %s6275_s4 = inlined_call_operand.vmem [shape: f32[1,128], index: 4, kind: input, shape index: {}]   ;;  %s6276_s5 = inlined_call_operand.vmem [shape: bf16[5,128,256], index: 5, kind: input, shape index: {}]   ;;  %s6277_s6 = inlined_call_operand.vmem [shape: f32[1,256], index: 6, kind: input, shape index: {}]   ;;  %s6278_s7 = inlined_call_operand.vmem [shape: bf16[5,128,256], index: 7, kind: input, shape index: {}]   ;;  %s6279_s8 = inlined_call_operand.vmem [shape: f32[1,256], index: 8, kind: input, shape index: {}]   ;;  %s6280_s9 = inlined_call_operand.vmem [shape: bf16[2,128,64], index: 9, kind: input, shape index: {}]   ;;  %s6281_s10 = inlined_call_operand.vmem [shape: f32[2,1,64], index: 10, kind: input, shape index: {}]   ;;  %s6282_s11 = inlined_call_operand.vmem [shape: bf16[2,128,64], index: 11, kind: input, shape index: {}]   ;;  %s6283_s12 = inlined_call_operand.vmem [shape: f32[2,1,64], index: 12, kind: input, shape index: {}]   ;;  %s6284_s13 = inlined_call_operand.vmem [shape: bf16[2,128,64], index: 13, kind: input, shape index: {}]   ;;  %s6285_s14 = inlined_call_operand.vmem [shape: f32[2,1,64], index: 14, kind: input, shape index: {}]   ;;  %s6286_s15 = inlined_call_operand.vmem [shape: bf16[2,64,128], index: 15, kind: input, shape index: {}]   ;;  %s6287_s16 = inlined_call_operand.vmem [shape: f32[1,128], index: 16, kind: input, shape index: {}]   ;;  %s6288_s17 = inlined_call_operand.vmem [shape: bf16[128,128], index: 17, kind: input, shape index: {}]   ;;  %s6289_s18 = inlined_call_operand.vmem [shape: f32[1,128], index: 18, kind: input, shape index: {}]   ;;  %s6290_s19 = inlined_call_operand.hbm [shape: f32[2,1,128], index: 19, kind: output, shape index: {}]  }
   0x1   :  { %6301 = sst [smem:[#allocation11_spill]] %s6271_s0 }
   0x2   :  { %6302 = sst [smem:[#allocation12_spill]] %s6272_s1 }
   0x3   :  { %6303 = sst [smem:[#allocation13_spill]] %s6273_s2 }
   0x4   :  { %6304 = sst [smem:[#allocation14_spill]] %s6274_s3 }
   0x5   :  { %6305 = sst [smem:[#allocation15_spill]] %s6290_s19 }
   0x6   :  { %24 = vsyncpa [#allocation3], 0 }
   0x7   :  { %26 = vsyncpa [#allocation3 + $0x1], 0  ;;  %s5151_s0 = smov 0   ;;  %s5153_s30 = smov 0  }
   0x8   :  { %s5155_s20 = smov 0   ;;  %s5157_s21 = smov 0  }
   0x9 LB: > { %6306 = sst [smem:[#allocation5_spill]] %s5032_s0  ;;  %s5172_s1 = sadd.s32 4294967295, %s5044_s21   ;;  %s5044_s21 = sphi %s5157_s21, %s6325_s21   ;;  %s5040_s20 = sphi %s5155_s20, %s6327_s20   ;;  %s5036_s30 = sphi %s5153_s30, %s6329_s30   ;;  %s5032_s0 = sphi %s5151_s0, %s6328_s0  }
   0xa   : > { %6307 = sst [smem:[#allocation6_spill]] %s5040_s20  ;;  %s3757_s22 = sadd.s32 4294967294, %s5044_s21  }
   0xb   : > { %6308 = sst [smem:[#allocation7_spill]] %s5044_s21  ;;  %s5176_s2 = sadd.s32 1, %s5044_s21  }
   0xc   : > { %6309 = sst [smem:[#allocation8_spill]] %s5176_s2  ;;  %s443_s23 = sadd.s32 1, %s5040_s20 }
   0xd   : > { %s440_s24 = ssub.s32 %s5044_s21, %s5176_s2  ;;  %p453_p0 = scmp.ne.s32.totalorder %s5040_s20, %s5036_s30 }
   0xe   : > { %p441_p1 = scmp.eq.s32.totalorder %s440_s24, 0  ;;  %p454_p2 = scmp.eq.s32.totalorder %s5172_s1, 1 }
   0xf   : > { %p459_p3 = scmp.ne.s32.totalorder %s5036_s30, %s5032_s0  ;;  %p460_p4 = scmp.eq.s32.totalorder %s3757_s22, 1 }
  0x10   : > { %s5187_s25 = scalar_select %p441_p1, %s5040_s20, %s443_s23  }
  0x11   : > { %p5189_p5 = por %p454_p2, %p453_p0  ;;  %p5193_p6 = por %p460_p4, %p459_p3 }
  0x12   : > { %6310 = sst [smem:[#allocation9_spill]] %s5187_s25  ;;  %p3760_p7 = scmp.ge.s32.totalorder %s5044_s21, 1 }
  0x13   : > { %s6312_s26 = scalar_select %p5193_p6, 1, 0 }
  0x14   : > { %p540_p8 = scmp.lt.s32.totalorder %s5044_s21, 3 }
  0x15   : > { %6313 = sst [smem:[#allocation10_spill]] %s6312_s26 }
  0x16   : > { %p541_p9 = pnand %p3760_p7, %p540_p8 }
  0x17   : > { %s6314_s29 = sld [smem:[#allocation12_spill]] (!%p541_p9)  ;;  %v5046_v1 = vmov (!%p541_p9), 0.0   ;;  %vm5047_vm0 = vmmov (!%p541_p9), 0   ;;  %p595_p10 = scmp.lt.s32.totalorder (!%p541_p9), %s5172_s1, 1  ;;  %vm651_vm1 = vcmask (!%p541_p9), 654336   ;;  %vm884_vm6 = vcmask (!%p541_p9), 1041408  }
  0x18   : > { %544 = sbr.rel (%p541_p9) target bundleno = 3557 (0xde5), region = 96  ;;  %4312 = vmatprep.subr.bf16.mxu0 (!%p541_p9), %v5046_v1  ;;  %4326 = vmatprep.subr.bf16.mxu1 (!%p541_p9), %v5046_v1  ;;  %s6315_s26 = sld [smem:[#allocation11_spill]] (!%p541_p9)  ;;  %v4632_v59 = vld [vmem:[%s6276_s5 + $0x4] ss:$8 sps:$4 sm:$0xff] (!%p541_p9)   ;;  %v4630_v60 = vld [vmem:[%s6276_s5] ss:$8 sps:$4 sm:$0xff] (!%p541_p9)   ;;  %vm3795_vm7 = vmneg (!%p541_p9), %vm884_vm6 }
  0x19   : > { %4322 = vmatprep.mubr.msk.bf16.mxu0 (!%p541_p9), %vm5047_vm0, %v5046_v1  ;;  %4342 = vmatprep.mubr.msk.bf16.mxu1 (!%p541_p9), %vm5047_vm0, %v5046_v1  ;;  %s6316_s20 = sld [smem:[#allocation14_spill]] (!%p541_p9)  ;;  %s6318_s28 = sld [smem:[#allocation13_spill]] (!%p541_p9)  ;;  %v4635_v61 = vld [vmem:[%s6276_s5 + $0x14] ss:$8 sps:$4 sm:$0xff] (!%p541_p9)   ;;  %v4633_v62 = vld [vmem:[%s6276_s5 + $0x10] ss:$8 sps:$4 sm:$0xff] (!%p541_p9)  }
  0x1a   : > { %v4638_v63 = vld [vmem:[%s6276_s5 + $0x24] ss:$8 sps:$4 sm:$0xff] (!%p541_p9)   ;;  %vm5049_vm8 = vmmov (!%p541_p9), 1   ;;  %vm1530_vm10 = vcmask (!%p541_p9), 1045504   ;;  %vm1066_vm11 = vsmask.f32 (!%p541_p9), 7424 }
  0x1b   : > { %vm5332_vm9 = vmpackc.low (!%p541_p9), %vm5049_vm8, %vm3795_vm7  ;;  %vm1226_vm12 = vcmask (!%p541_p9), 1046528   ;;  %vm1375_vm13 = vsmask.f32 (!%p541_p9), 6400  ;;  %s4212_s21 = sshll.u32 (!%p541_p9), %s5172_s1, 4  ;;  %s6321_s27 = sld [smem:[#allocation15_spill]] (!%p541_p9) }
  0x1d   : > { %v4617_v0 = vld [vmem:[%s6314_s29] sm:$0xff] (!%p541_p9)   ;;  %v4618_v2 = vld [vmem:[%s6314_s29 + $0x8] sm:$0xff] (!%p541_p9)   ;;  %v4619_v3 = vld [vmem:[%s6314_s29 + $0x10] sm:$0xff] (!%p541_p9)  }
  0x1e   : > { %4313 = vmatpush3.bf16.msra.mxu0 (!%p541_p9), %v4617_v0  ;;  %v4620_v4 = vld [vmem:[%s6314_s29 + $0x18] sm:$0xff] (!%p541_p9)   ;;  %v4621_v5 = vld [vmem:[%s6314_s29 + $0x20] sm:$0xff] (!%p541_p9)  }
  0x1f   : > { %4314 = vmatprep.subr.bf16.mxu0 %v5046_v1  ;;  %s596_s24 = scalar_select %p595_p10, %s5172_s1, 1  ;;  %v4622_v9 = vld [vmem:[%s6316_s20] sm:$0xff]  }
  0x20   : > { %s6317_s2 = smov %s6316_s20  ;;  %4327 = vmatpush3.bf16.msra.mxu1 %v4622_v9  ;;  %v3763_v17 = vld [vmem:[%s6318_s28] ss:$0 sm:$0xff]  ;;  %s5050_s1 = smov [#allocation2]  }
  0x21   : > { %s4215_s25 = sshll.u32 %s596_s24, 4  ;;  %4328 = vmatprep.subr.bf16.mxu1 %v5046_v1  ;;  %v4623_v10 = vld [vmem:[%s6317_s2 + $0x8] sm:$0xff]   ;;  %v4624_v11 = vld [vmem:[%s6317_s2 + $0x10] sm:$0xff]   ;;  %v4625_v12 = vld [vmem:[%s6317_s2 + $0x18] sm:$0xff]   ;;  %s6229_s20 = scalar_lea.hbm %s6321_s27, %s4212_s21 }
  0x22   : > { %4315 = vmatpush3.bf16.msra.mxu0 %v4618_v2  ;;  %s599_s0 = scalar_lea.vmem %s6315_s26, %s4215_s25  ;;  %v4626_v13 = vld [vmem:[%s6317_s2 + $0x20] sm:$0xff]   ;;  %v4627_v14 = vld [vmem:[%s6317_s2 + $0x28] sm:$0xff]   ;;  %v4628_v15 = vld [vmem:[%s6317_s2 + $0x30] sm:$0xff]   ;;  %s4986_s19 = sshll.u32 %s5050_s1, 4  ;;  %s4987_s19 = int_to_ptr.vmem [resolvable:$false] %s4986_s19 }
  0x23   : > { %4316 = vmatprep.subr.bf16.mxu0 %v5046_v1  ;;  %v601_v6 = vld [vmem:[%s599_s0] sm:$0xff]  ;;  %v602_v7 = vld [vmem:[%s599_s0 + $0x8] sm:$0xff]  ;;  %v4629_v16 = vld [vmem:[%s6317_s2 + $0x38] sm:$0xff]   ;;  %s593_s0 = sand.u32 1, %s5036_s30   ;;  %s4988_s2 = scalar_lea.vmem %s4987_s19, 32 }
  0x24   : > { %v603_v8 = vpack.c.bf16 %v602_v7, %v601_v6  ;;  %4329 = vmatpush3.bf16.msra.mxu1 %v4623_v10  ;;  %v4636_v0 = vld [vmem:[%s6276_s5 + $0x20] ss:$8 sps:$4 sm:$0xff]   ;;  %v4641_v2 = vld [vmem:[%s6276_s5 + $0x34] ss:$8 sps:$4 sm:$0xff]   ;;  %v4645_v7 = vld [vmem:[%s6276_s5 + $0x50] ss:$8 sps:$4 sm:$0xff]  }
  0x25   : > { %4330 = vmatprep.subr.bf16.mxu1 %v5046_v1  ;;  %v4647_v6 = vld [vmem:[%s6276_s5 + $0x54] ss:$8 sps:$4 sm:$0xff]   ;;  %v4648_v9 = vld [vmem:[%s6276_s5 + $0x60] ss:$8 sps:$4 sm:$0xff]   ;;  %s594_s28 = scalar_lea.vmem [#allocation2], %s593_s0  ;;  %s3690_s25 = scalar_lea.sflag [#allocation3], %s593_s0 }
  0x26   : > { %4317 = vmatpush3.bf16.msra.mxu0 %v4619_v3  ;;  %v4639_v3 = vld [vmem:[%s6276_s5 + $0x30] ss:$8 sps:$4 sm:$0xff]   ;;  %v4653_v10 = vld [vmem:[%s6276_s5 + $0x74] ss:$8 sps:$4 sm:$0xff]   ;;  %s3702_s22 = sshll.u32 %s594_s28, 4  ;;  %s6231_s22 = int_to_ptr.vmem [resolvable:$true] %s3702_s22 }
  0x27   : > { %4318 = vmatprep.subr.bf16.mxu0 %v5046_v1  ;;  %s4982_s26 = scalar_lea.vmem %s6231_s22, 16  ;;  %p4989_p0 = scmp.lt.s32.totalorder %s6231_s22, %s4987_s19 }
  0x28   : > { %4331 = vmatpush3.bf16.msra.mxu1 %v4624_v11  ;;  %v4651_v11 = vld [vmem:[%s6276_s5 + $0x70] ss:$8 sps:$4 sm:$0xff]   ;;  %p4983_p11 = scmp.ne.s32.totalorder %s6231_s22, %s4982_s26  ;;  %p4990_p1 = scmp.lt.s32.totalorder %s4988_s2, %s4982_s26 }
  0x29   : > { %4332 = vmatprep.subr.bf16.mxu1 %v5046_v1 }
  0x2a   : > { %4319 = vmatpush3.bf16.msra.mxu0 %v4620_v4  ;;  %v4644_v4 = vld [vmem:[%s6276_s5 + $0x44] ss:$8 sps:$4 sm:$0xff]   ;;  %p4984_p12 = pnand %p4983_p11, %p5189_p5  ;;  %p4991_p2 = por %p4990_p1, %p4989_p0 }
  0x2b   : > { %4320 = vmatprep.subr.bf16.mxu0 %v5046_v1 }
  0x2c   : > { %4333 = vmatpush3.bf16.msra.mxu1 %v4625_v12  ;;  %v4656_v12 = vld [vmem:[%s6276_s5 + $0x84] ss:$8 sps:$4 sm:$0xff]   ;;  %p4985_p13 = pneg %p4984_p12 }
  0x2d   : > { %4334 = vmatprep.subr.bf16.mxu1 %v5046_v1 }
  0x2e   : > { %4321 = vmatpush3.bf16.msra.mxu0 %v4621_v5  ;;  %v4642_v5 = vld [vmem:[%s6276_s5 + $0x40] ss:$8 sps:$4 sm:$0xff]   ;;  %p4992_p3 = pnand %p4991_p2, %p4985_p13 }
  0x2f   : > { %990 = vmatprep.subr.bf16.mxu0 %v4632_v59  ;;  %v4654_v59 = vld [vmem:[%s6276_s5 + $0x80] ss:$8 sps:$4 sm:$0xff]  }
  0x30   : > { %4335 = vmatpush3.bf16.msra.mxu1 %v4626_v13  ;;  %v5048_v13 = vmov 0  }
  0x31   : > { %4323 = vmatmul.mubr.msk.bf16.vlgmr.msra.gmra.mrb[0].mxu0 %vm651_vm1, %v603_v8  ;;  %4336 = vmatprep.subr.bf16.mxu1 %v5046_v1  ;;  %v4650_v8 = vld [vmem:[%s6276_s5 + $0x64] ss:$8 sps:$4 sm:$0xff]  }
  0x32   : > { %991 = vmatpush1.bf16.msra.mxu0 %v4630_v60  ;;  %1022 = vmatprep.mubr.bf16.mxu0 %v5048_v13 }
  0x33   : > { %992 = vmatprep.subr.bf16.mxu0 %v4635_v61  ;;  %v4780_v61 = vld [vmem:[%s6278_s7 + $0xa0] ss:$8 sps:$4 sm:$0xff]  }
  0x34   : > { %4337 = vmatpush3.bf16.msra.mxu1 %v4627_v14  ;;  %v3770_v14 = vld [vmem:[%s6275_s4] ss:$0 sm:$0xff] }
  0x35   : > { %4338 = vmatprep.subr.bf16.mxu1 %v5046_v1 }
  0x36   : > { %993 = vmatpush1.bf16.msra.mxu0 %v4633_v62 }
  0x37   : > { %994 = vmatprep.subr.bf16.mxu0 %v4638_v63 }
  0x38   : > { %4339 = vmatpush3.bf16.msra.mxu1 %v4628_v15 }
  0x39   : > { %4340 = vmatprep.subr.bf16.mxu1 %v5046_v1 }
  0x3a   : > { %995 = vmatpush1.bf16.msra.mxu0 %v4636_v0 }
  0x3b   : > { %996 = vmatprep.subr.bf16.mxu0 %v4641_v2  ;;  %v4659_v2 = vld [vmem:[%s6276_s5 + $0x94] ss:$8 sps:$4 sm:$0xff]  }
  0x3c   : > { %4341 = vmatpush3.bf16.msra.mxu1 %v4629_v16 }
  0x3e   : > { %997 = vmatpush1.bf16.msra.mxu0 %v4639_v3  ;;  %v4657_v3 = vld [vmem:[%s6276_s5 + $0x90] ss:$8 sps:$4 sm:$0xff]  }
  0x3f   : > { %998 = vmatprep.subr.bf16.mxu0 %v4644_v4 }
  0x42   : > { %999 = vmatpush1.bf16.msra.mxu0 %v4642_v5 }
  0x43   : > { %1000 = vmatprep.subr.bf16.mxu0 %v4647_v6  ;;  %v4662_v6 = vld [vmem:[%s6276_s5 + $0xa4] ss:$8 sps:$4 sm:$0xff]  }
  0x46   : > { %1001 = vmatpush1.bf16.msra.mxu0 %v4645_v7 }
  0x47   : > { %1002 = vmatprep.subr.bf16.mxu0 %v4650_v8  ;;  %v4660_v8 = vld [vmem:[%s6276_s5 + $0xa0] ss:$8 sps:$4 sm:$0xff]  }
  0x4a   : > { %1003 = vmatpush1.bf16.msra.mxu0 %v4648_v9  ;;  %v4665_v9 = vld [vmem:[%s6276_s5 + $0xb4] ss:$8 sps:$4 sm:$0xff]  }
  0x4b   : > { %1004 = vmatprep.subr.bf16.mxu0 %v4653_v10  ;;  %v4663_v10 = vld [vmem:[%s6276_s5 + $0xb0] ss:$8 sps:$4 sm:$0xff]  }
  0x4e   : > { %1005 = vmatpush1.bf16.msra.mxu0 %v4651_v11  ;;  %v4668_v11 = vld [vmem:[%s6276_s5 + $0xc4] ss:$8 sps:$4 sm:$0xff]  }
  0x4f   : > { %1160 = vmatprep.subr.bf16.mxu0 %v4656_v12  ;;  %v4666_v12 = vld [vmem:[%s6276_s5 + $0xc0] ss:$8 sps:$4 sm:$0xff]  }
 0x104   : > { %v689_v18 = vpop.f32.mrb[0].mxu0 }
 0x105   : > { %v690_v19 = vadd.f32 %v3763_v17, %v689_v18  ;;  %v4324_v20 = vpop.f32.mrb[1].mxu0 }
 0x106   : > { %v692_v21 = vpop.f32.mrb[2].mxu0 }
 0x107   : > { %v696_v22 = vand.u32 2147483647, %v690_v19  ;;  %v693_v23 = vadd.f32 %v3763_v17, %v692_v21  ;;  %v4325_v24 = vpop.f32.mrb[3].mxu0  ;;  %vm706_vm2 = vcmp.ge.f32.partialorder %v690_v19, 0.0 }
 0x109   : > { %v698_v25 = vsub.f32 0.0, %v696_v22  ;;  %v697_v26 = vand.u32 2147483647, %v693_v23  ;;  %vm707_vm3 = vcmp.ge.f32.partialorder %v693_v23, 0.0 }
 0x10b   : > { %v700_v27 = vmul.f32 1.442695, %v698_v25  ;;  %v699_v28 = vsub.f32 0.0, %v697_v26 }
 0x10d   : > { %4934 = vpow2.f32 %v700_v27  ;;  %v702_v29 = vmul.f32 1.442695, %v699_v28 }
 0x10f   : > { %4936 = vpow2.f32 %v702_v29 }
 0x117   : > { %v4935_v30 = vpop.eup %4934 }
 0x118   : > { %v704_v31 = vmul.f32 %v4935_v30, %v4935_v30  ;;  %v708_v32 = vmul.f32 2.0, %v4935_v30 }
 0x119   : > { %v4937_v33 = vpop.eup %4936 }
 0x11a   : > { %v710_v34 = vadd.f32 1.0, %v708_v32  ;;  %v716_v35 = vmul.f32 2.0, %v704_v31  ;;  %v720_v36 = vadd.f32 2.0, %v708_v32  ;;  %v705_v37 = vmul.f32 %v4937_v33, %v4937_v33 }
 0x11b   : > { %v709_v38 = vmul.f32 2.0, %v4937_v33  ;;  %v712_v48 = vadd.f32 %v708_v32, %v704_v31 }
 0x11c   : > { %v718_v39 = vadd.f32 %v716_v35, %v710_v34  ;;  %v722_v40 = vadd.f32 %v720_v36, %v704_v31  ;;  %v717_v42 = vmul.f32 2.0, %v705_v37 }
 0x11d   : > { %v711_v41 = vadd.f32 1.0, %v709_v38  ;;  %v721_v44 = vadd.f32 2.0, %v709_v38  ;;  %v713_v49 = vadd.f32 %v709_v38, %v705_v37  ;;  %v714_v50 = vsel %vm706_vm2, %v710_v34, %v712_v48 }
 0x11e   : > { %v724_v43 = vsel %vm706_vm2, %v718_v39, %v722_v40  ;;  %v726_v53 = vmul.f32 %v714_v50, %v690_v19 }
 0x11f   : > { %v719_v45 = vadd.f32 %v717_v42, %v711_v41  ;;  %v723_v46 = vadd.f32 %v721_v44, %v705_v37  ;;  %4938 = vrcp.f32 %v724_v43  ;;  %v715_v51 = vsel %vm707_vm3, %v711_v41, %v713_v49 }
 0x120   : > { %v727_v54 = vmul.f32 %v715_v51, %v693_v23 }
 0x121   : > { %v725_v47 = vsel %vm707_vm3, %v719_v45, %v723_v46  ;;  %vm2823_vm3 = vcmask 523264  }
 0x122   : > { %4940 = vrcp.f32 %v725_v47 }
 0x129   : > { %v4939_v52 = vpop.eup %4938 }
 0x12a   : > { %v729_v56 = vmul.f32 %v4939_v52, %v726_v53 }
 0x12c   : > { %v4941_v55 = vpop.eup %4940 }
 0x12d   : > { %v731_v57 = vmul.f32 %v4941_v55, %v727_v54 }
 0x12f   : > { %v732_v58 = vpack.c.bf16 %v731_v57, %v729_v56 }
 0x131   : > { %4343 = vmatmul.mubr.bf16.vlgmr.msra.gmra.mrb[0].mxu1 %v732_v58 }
 0x132   : > { %1824 = vmatprep.mubr.bf16.mxu1 %v5048_v13 }
 0x204   : > { %v838_v15 = vpop.f32.mrb[0].mxu1 }
 0x205   : > { %v839_v16 = vadd.f32 %v3770_v14, %v838_v15  ;;  %v4344_v17 = vpop.f32.mrb[1].mxu1  ;;  %v4669_v15 = vld [vmem:[%s6276_s5 + $0xd0] ss:$8 sps:$4 sm:$0xff]  }
 0x206   : > { %v841_v18 = vpop.f32.mrb[2].mxu1 }
 0x207   : > { %v845_v19 = vand.u32 2147483647, %v839_v16  ;;  %v842_v20 = vadd.f32 %v3770_v14, %v841_v18  ;;  %v4345_v21 = vpop.f32.mrb[3].mxu1  ;;  %vm855_vm4 = vcmp.ge.f32.partialorder %v839_v16, 0.0  ;;  %v4671_v14 = vld [vmem:[%s6276_s5 + $0xd4] ss:$8 sps:$4 sm:$0xff]  }
 0x208   : > { %v4672_v18 = vld [vmem:[%s6276_s5 + $0xe0] ss:$8 sps:$4 sm:$0xff]   ;;  %v4675_v21 = vld [vmem:[%s6276_s5 + $0xf0] ss:$8 sps:$4 sm:$0xff]  }
 0x209   : > { %v847_v22 = vsub.f32 0.0, %v845_v19  ;;  %v846_v23 = vand.u32 2147483647, %v842_v20  ;;  %vm856_vm5 = vcmp.ge.f32.partialorder %v842_v20, 0.0  ;;  %v4677_v19 = vld [vmem:[%s6276_s5 + $0xf4] ss:$8 sps:$4 sm:$0xff]  }
 0x20b   : > { %v849_v24 = vmul.f32 1.442695, %v847_v22  ;;  %v848_v25 = vsub.f32 0.0, %v846_v23 }
 0x20d   : > { %4942 = vpow2.f32 %v849_v24  ;;  %v851_v26 = vmul.f32 1.442695, %v848_v25  ;;  %v4680_v24 = vld [vmem:[%s6276_s5 + $0x104] ss:$8 sps:$4 sm:$0xff]  }
 0x20f   : > { %4944 = vpow2.f32 %v851_v26 }
 0x217   : > { %v4943_v27 = vpop.eup %4942 }
 0x218   : > { %v853_v28 = vmul.f32 %v4943_v27, %v4943_v27  ;;  %v857_v29 = vmul.f32 2.0, %v4943_v27  ;;  %v4678_v27 = vld [vmem:[%s6276_s5 + $0x100] ss:$8 sps:$4 sm:$0xff]  }
 0x219   : > { %v4945_v30 = vpop.eup %4944 }
 0x21a   : > { %v859_v31 = vadd.f32 1.0, %v857_v29  ;;  %v865_v32 = vmul.f32 2.0, %v853_v28  ;;  %v869_v33 = vadd.f32 2.0, %v857_v29  ;;  %v854_v34 = vmul.f32 %v4945_v30, %v4945_v30 }
 0x21b   : > { %v858_v35 = vmul.f32 2.0, %v4945_v30  ;;  %v861_v44 = vadd.f32 %v857_v29, %v853_v28  ;;  %v4681_v30 = vld [vmem:[%s6276_s5 + $0x110] ss:$8 sps:$4 sm:$0xff]  }
 0x21c   : > { %v867_v36 = vadd.f32 %v865_v32, %v859_v31  ;;  %v871_v37 = vadd.f32 %v869_v33, %v853_v28  ;;  %v866_v39 = vmul.f32 2.0, %v854_v34  ;;  %v4683_v28 = vld [vmem:[%s6276_s5 + $0x114] ss:$8 sps:$4 sm:$0xff]   ;;  %v4684_v32 = vld [vmem:[%s6276_s5 + $0x120] ss:$8 sps:$4 sm:$0xff]  }
 0x21d   : > { %v860_v38 = vadd.f32 1.0, %v858_v35  ;;  %v870_v41 = vadd.f32 2.0, %v858_v35  ;;  %v863_v46 = vsel %vm855_vm4, %v859_v31, %v861_v44  ;;  %v862_v47 = vadd.f32 %v858_v35, %v854_v34  ;;  %v4686_v31 = vld [vmem:[%s6276_s5 + $0x124] ss:$8 sps:$4 sm:$0xff]   ;;  %v4689_v33 = vld [vmem:[%s6276_s5 + $0x134] ss:$8 sps:$4 sm:$0xff]  }
 0x21e   : > { %v873_v40 = vsel %vm855_vm4, %v867_v36, %v871_v37  ;;  %v875_v48 = vmul.f32 %v863_v46, %v839_v16  ;;  %v4674_v16 = vld [vmem:[%s6276_s5 + $0xe4] ss:$8 sps:$4 sm:$0xff]   ;;  %v4690_v36 = vld [vmem:[%s6276_s5 + $0x140] ss:$8 sps:$4 sm:$0xff]   ;;  %v4695_v37 = vld [vmem:[%s6276_s5 + $0x154] ss:$8 sps:$4 sm:$0xff]  }
 0x21f   : > { %4946 = vrcp.f32 %v873_v40  ;;  %v868_v42 = vadd.f32 %v866_v39, %v860_v38  ;;  %v872_v43 = vadd.f32 %v870_v41, %v854_v34  ;;  %v864_v50 = vsel %vm856_vm5, %v860_v38, %v862_v47  ;;  %v4687_v34 = vld [vmem:[%s6276_s5 + $0x130] ss:$8 sps:$4 sm:$0xff]   ;;  %v4692_v35 = vld [vmem:[%s6276_s5 + $0x144] ss:$8 sps:$4 sm:$0xff]   ;;  %v4696_v40 = vld [vmem:[%s6276_s5 + $0x160] ss:$8 sps:$4 sm:$0xff]  }
 0x220   : > { %v876_v52 = vmul.f32 %v864_v50, %v842_v20  ;;  %v4693_v38 = vld [vmem:[%s6276_s5 + $0x150] ss:$8 sps:$4 sm:$0xff]   ;;  %v4698_v39 = vld [vmem:[%s6276_s5 + $0x164] ss:$8 sps:$4 sm:$0xff]   ;;  %v4701_v41 = vld [vmem:[%s6276_s5 + $0x174] ss:$8 sps:$4 sm:$0xff]  }
 0x221   : > { %v874_v45 = vsel %vm856_vm5, %v868_v42, %v872_v43  ;;  %v4699_v42 = vld [vmem:[%s6276_s5 + $0x170] ss:$8 sps:$4 sm:$0xff]   ;;  %v4704_v43 = vld [vmem:[%s6276_s5 + $0x184] ss:$8 sps:$4 sm:$0xff]   ;;  %v4702_v46 = vld [vmem:[%s6276_s5 + $0x180] ss:$8 sps:$4 sm:$0xff]  }
 0x222   : > { %4948 = vrcp.f32 %v874_v45  ;;  %v4707_v47 = vld [vmem:[%s6276_s5 + $0x194] ss:$8 sps:$4 sm:$0xff]   ;;  %v4710_v50 = vld [vmem:[%s6276_s5 + $0x1a4] ss:$8 sps:$4 sm:$0xff]   ;;  %vm2871_vm4 = vcmask 130048  }
 0x229   : > { %v4947_v49 = vpop.eup %4946 }
 0x22a   : > { %v5319_v51 = vmul.f32 %v4947_v49, %v875_v48  ;;  %v4705_v49 = vld [vmem:[%s6276_s5 + $0x190] ss:$8 sps:$4 sm:$0xff]  }
 0x22c   : > { %v4949_v53 = vpop.eup %4948  ;;  %v885_v54 = vrot.slane %v5319_v51, 6 }
 0x22d   : > { %v5322_v55 = vmul.f32 %v4949_v53, %v876_v52  ;;  %v4708_v52 = vld [vmem:[%s6276_s5 + $0x1a0] ss:$8 sps:$4 sm:$0xff]   ;;  %v4713_v53 = vld [vmem:[%s6276_s5 + $0x1b4] ss:$8 sps:$4 sm:$0xff]  }
 0x22e   : > { %v891_v57 = vsel %vm884_vm6, 0.0, %v885_v54 }
 0x22f   : > { %v886_v56 = vrot.slane %v5322_v55, 6 }
 0x231   : > { %v892_v58 = vsel %vm884_vm6, %v886_v56, 0.0  ;;  %v887_v60 = vsel %vm884_vm6, %v885_v54, %v886_v56  ;;  %v4716_v56 = vld [vmem:[%s6276_s5 + $0x1c4] ss:$8 sps:$4 sm:$0xff]  }
 0x232   : > { %v5336_v62 = vpack.c.bf16 %v892_v58, %v892_v58  ;;  %v5338_v63 = vpack.c.bf16 %v887_v60, %v891_v57  ;;  %v3797_v0 = vpack.c.bf16 %v887_v60, %v885_v54  ;;  %v4711_v54 = vld [vmem:[%s6276_s5 + $0x1b0] ss:$8 sps:$4 sm:$0xff]   ;;  %v4714_v57 = vld [vmem:[%s6276_s5 + $0x1c0] ss:$8 sps:$4 sm:$0xff]   ;;  %v4719_v58 = vld [vmem:[%s6276_s5 + $0x1d4] ss:$8 sps:$4 sm:$0xff]  }
 0x233   : > { %v4722_v60 = vld [vmem:[%s6276_s5 + $0x1e4] ss:$8 sps:$4 sm:$0xff]  }
 0x234   : > { %3798 = vmatmul.mubr.msk.bf16.vlgmr.msra.gmra.mrb[4].mxu0 %vm5332_vm9, %v3797_v0  ;;  %v1531_v4 = vrot.slane %v5338_v63, 2  ;;  %v1532_v5 = vrot.slane %v5336_v62, 2  ;;  %v1070_v17 = vshll.u32 %v5338_v63, 16  ;;  %v1068_v22 = vshrl.u32 %v5338_v63, 16 }
 0x235   : > { %1161 = vmatpush1.bf16.msra.mxu0 %v4654_v59  ;;  %1192 = vmatprep.mubr.bf16.mxu0 %v5048_v13  ;;  %v1075_v23 = vshll.u32 %v5336_v62, 16  ;;  %v1227_v44 = vrot.slane %v5338_v63, 1  ;;  %v1228_v45 = vrot.slane %v5336_v62, 1  ;;  %v4717_v59 = vld [vmem:[%s6276_s5 + $0x1d0] ss:$8 sps:$4 sm:$0xff]   ;;  %v1379_v0 = vshrl.u32 %v5336_v62, 16 }
 0x236   : > { %1162 = vmatprep.subr.bf16.mxu0 %v4659_v2  ;;  %v5355_v7 = vsel %vm1530_vm10, %v1531_v4, %v1532_v5  ;;  %v1072_v20 = vrot.slane %v1070_v17, 1  ;;  %v4720_v2 = vld [vmem:[%s6276_s5 + $0x1e0] ss:$8 sps:$4 sm:$0xff]   ;;  %v1376_v4 = vrot.slane %v1068_v22, 1  ;;  %v1377_v5 = vrot.slane %v1070_v17, 2 }
 0x237   : > { %v1077_v26 = vrot.slane %v1075_v23, 1  ;;  %v1229_v48 = vsel %vm1226_vm12, %v1227_v44, %v1228_v45  ;;  %v4726_v63 = vld [vmem:[%s6276_s5 + $0x200] ss:$8 sps:$4 sm:$0xff]   ;;  %v4731_v62 = vld [vmem:[%s6276_s5 + $0x214] ss:$8 sps:$4 sm:$0xff]   ;;  %v1034_v44 = vlaneseq }
 0x238   : > { %v1073_v25 = vor.u32 %v1072_v20, %v1068_v22  ;;  %v4732_v17 = vld [vmem:[%s6276_s5 + $0x220] ss:$8 sps:$4 sm:$0xff]   ;;  %v4740_v20 = vld [vmem:[%s6276_s5 + $0x244] ss:$8 sps:$4 sm:$0xff]   ;;  %v4743_v22 = vld [vmem:[%s6276_s5 + $0x254] ss:$8 sps:$4 sm:$0xff]  }
 0x239   : > { %1163 = vmatpush1.bf16.msra.mxu0 %v4657_v3  ;;  %v4725_v3 = vld [vmem:[%s6276_s5 + $0x1f4] ss:$8 sps:$4 sm:$0xff]   ;;  %v5613_v45 = vshrl.u32 %v1034_v44, 7  ;;  %v4795_v44 = vld [vmem:[%s6278_s7 + $0xf0] ss:$8 sps:$4 sm:$0xff]  }
 0x23a   : > { %1164 = vmatprep.subr.bf16.mxu0 %v4662_v6  ;;  %v1078_v29 = vsel %vm1066_vm11, %v1073_v25, %v1077_v26  ;;  %v1381_v6 = vrot.slane %v1379_v0, 1  ;;  %v4744_v25 = vld [vmem:[%s6276_s5 + $0x260] ss:$8 sps:$4 sm:$0xff]   ;;  %v4749_v26 = vld [vmem:[%s6276_s5 + $0x274] ss:$8 sps:$4 sm:$0xff]  }
 0x23d   : > { %1165 = vmatpush1.bf16.msra.mxu0 %v4660_v8  ;;  %v1382_v8 = vrot.slane %v1075_v23, 2  ;;  %v4741_v23 = vld [vmem:[%s6276_s5 + $0x250] ss:$8 sps:$4 sm:$0xff]  }
 0x23e   : > { %1166 = vmatprep.subr.bf16.mxu0 %v4665_v9  ;;  %v4723_v9 = vld [vmem:[%s6276_s5 + $0x1f0] ss:$8 sps:$4 sm:$0xff]  }
 0x241   : > { %1167 = vmatpush1.bf16.msra.mxu0 %v4663_v10  ;;  %v4728_v10 = vld [vmem:[%s6276_s5 + $0x204] ss:$8 sps:$4 sm:$0xff]  }
 0x242   : > { %1168 = vmatprep.subr.bf16.mxu0 %v4668_v11  ;;  %v1378_v11 = vor.u32 %v1377_v5, %v1376_v4 }
 0x245   : > { %1169 = vmatpush1.bf16.msra.mxu0 %v4666_v12  ;;  %v1383_v12 = vor.u32 %v1382_v8, %v1381_v6  ;;  %v1036_v8 = vsub.s32 0, %v5613_v45 }
 0x246   : > { %1170 = vmatprep.subr.bf16.mxu0 %v4671_v14 }
 0x247   : > { %v1384_v14 = vsel %vm1375_vm13, %v1378_v11, %v1383_v12 }
 0x249   : > { %1171 = vmatpush1.bf16.msra.mxu0 %v4669_v15  ;;  %v4729_v15 = vld [vmem:[%s6276_s5 + $0x210] ss:$8 sps:$4 sm:$0xff]  }
 0x24a   : > { %1172 = vmatprep.subr.bf16.mxu0 %v4674_v16  ;;  %v4734_v16 = vld [vmem:[%s6276_s5 + $0x224] ss:$8 sps:$4 sm:$0xff]  }
 0x24d   : > { %1173 = vmatpush1.bf16.msra.mxu0 %v4672_v18  ;;  %v4737_v18 = vld [vmem:[%s6276_s5 + $0x234] ss:$8 sps:$4 sm:$0xff]  }
 0x24e   : > { %1174 = vmatprep.subr.bf16.mxu0 %v4677_v19  ;;  %v4735_v19 = vld [vmem:[%s6276_s5 + $0x230] ss:$8 sps:$4 sm:$0xff]  }
 0x251   : > { %1175 = vmatpush1.bf16.msra.mxu0 %v4675_v21  ;;  %v4738_v21 = vld [vmem:[%s6276_s5 + $0x240] ss:$8 sps:$4 sm:$0xff]  }
 0x252   : > { %1311 = vmatprep.subr.bf16.mxu0 %v4680_v24  ;;  %v4746_v24 = vld [vmem:[%s6276_s5 + $0x264] ss:$8 sps:$4 sm:$0xff]  }
 0x254   : > { %1193 = vmatmul.mubr.bf16.vlgmr.msra.gmra.mrb[4].mxu0 %v1078_v29  ;;  %v4750_v29 = vld [vmem:[%s6278_s7] ss:$8 sps:$4 sm:$0xff]  }
 0x255   : > { %1312 = vmatpush1.bf16.msra.mxu0 %v4678_v27  ;;  %1343 = vmatprep.mubr.bf16.mxu0 %v5048_v13  ;;  %v4747_v27 = vld [vmem:[%s6276_s5 + $0x270] ss:$8 sps:$4 sm:$0xff]  }
 0x256   : > { %1313 = vmatprep.subr.bf16.mxu0 %v4683_v28  ;;  %v4752_v28 = vld [vmem:[%s6278_s7 + $0x4] ss:$8 sps:$4 sm:$0xff]  }
 0x257   : > { %1792 = vmatprep.subr.bf16.mxu1 %v4752_v28 }
 0x258   : > { %1793 = vmatpush1.bf16.msra.mxu1 %v4750_v29  ;;  %v4777_v29 = vld [vmem:[%s6278_s7 + $0x90] ss:$8 sps:$4 sm:$0xff]  }
 0x259   : > { %1314 = vmatpush1.bf16.msra.mxu0 %v4681_v30  ;;  %v4755_v30 = vld [vmem:[%s6278_s7 + $0x14] ss:$8 sps:$4 sm:$0xff]  }
 0x25a   : > { %1315 = vmatprep.subr.bf16.mxu0 %v4686_v31  ;;  %1794 = vmatprep.subr.bf16.mxu1 %v4755_v30  ;;  %v4758_v31 = vld [vmem:[%s6278_s7 + $0x24] ss:$8 sps:$4 sm:$0xff]  }
 0x25d   : > { %1316 = vmatpush1.bf16.msra.mxu0 %v4684_v32  ;;  %v4756_v32 = vld [vmem:[%s6278_s7 + $0x20] ss:$8 sps:$4 sm:$0xff]  }
 0x25e   : > { %1317 = vmatprep.subr.bf16.mxu0 %v4689_v33  ;;  %v4761_v33 = vld [vmem:[%s6278_s7 + $0x34] ss:$8 sps:$4 sm:$0xff]  }
 0x261   : > { %1318 = vmatpush1.bf16.msra.mxu0 %v4687_v34  ;;  %v4759_v34 = vld [vmem:[%s6278_s7 + $0x30] ss:$8 sps:$4 sm:$0xff]  }
 0x262   : > { %1319 = vmatprep.subr.bf16.mxu0 %v4692_v35  ;;  %v4764_v35 = vld [vmem:[%s6278_s7 + $0x44] ss:$8 sps:$4 sm:$0xff]  }
 0x265   : > { %1320 = vmatpush1.bf16.msra.mxu0 %v4690_v36  ;;  %v4762_v36 = vld [vmem:[%s6278_s7 + $0x40] ss:$8 sps:$4 sm:$0xff]  }
 0x266   : > { %1321 = vmatprep.subr.bf16.mxu0 %v4695_v37  ;;  %v4767_v37 = vld [vmem:[%s6278_s7 + $0x54] ss:$8 sps:$4 sm:$0xff]  }
 0x269   : > { %1322 = vmatpush1.bf16.msra.mxu0 %v4693_v38  ;;  %v4765_v38 = vld [vmem:[%s6278_s7 + $0x50] ss:$8 sps:$4 sm:$0xff]  }
 0x26a   : > { %1323 = vmatprep.subr.bf16.mxu0 %v4698_v39  ;;  %v4770_v39 = vld [vmem:[%s6278_s7 + $0x64] ss:$8 sps:$4 sm:$0xff]  }
 0x26d   : > { %1324 = vmatpush1.bf16.msra.mxu0 %v4696_v40  ;;  %v4768_v40 = vld [vmem:[%s6278_s7 + $0x60] ss:$8 sps:$4 sm:$0xff]  }
 0x26e   : > { %1325 = vmatprep.subr.bf16.mxu0 %v4701_v41  ;;  %v4773_v41 = vld [vmem:[%s6278_s7 + $0x74] ss:$8 sps:$4 sm:$0xff]  }
 0x271   : > { %1326 = vmatpush1.bf16.msra.mxu0 %v4699_v42  ;;  %v4771_v42 = vld [vmem:[%s6278_s7 + $0x70] ss:$8 sps:$4 sm:$0xff]  }
 0x272   : > { %1466 = vmatprep.subr.bf16.mxu0 %v4704_v43  ;;  %v4776_v43 = vld [vmem:[%s6278_s7 + $0x84] ss:$8 sps:$4 sm:$0xff]  }
 0x274   : > { %1344 = vmatmul.mubr.bf16.vlgmr.msra.gmra.mrb[4].mxu0 %v1229_v48 }
 0x275   : > { %1467 = vmatpush1.bf16.msra.mxu0 %v4702_v46  ;;  %1498 = vmatprep.mubr.bf16.mxu0 %v5048_v13  ;;  %v1040_v46 = vsub.s32 1, %v5613_v45  ;;  %v4886_v45 = vld [vmem:[%s6284_s13] sm:$0xff]  }
 0x276   : > { %1468 = vmatprep.subr.bf16.mxu0 %v4707_v47  ;;  %v881_v47 = vld [vmem:[%s6277_s6] sm:$0x3] }
 0x277   : > { %v1041_v48 = vrot.slane %v881_v47, %v1040_v46 }
 0x279   : > { %1469 = vmatpush1.bf16.msra.mxu0 %v4705_v49 }
 0x27a   : > { %1470 = vmatprep.subr.bf16.mxu0 %v4710_v50 }
 0x27d   : > { %1471 = vmatpush1.bf16.msra.mxu0 %v4708_v52 }
 0x27e   : > { %1472 = vmatprep.subr.bf16.mxu0 %v4713_v53 }
 0x281   : > { %1473 = vmatpush1.bf16.msra.mxu0 %v4711_v54 }
 0x282   : > { %1474 = vmatprep.subr.bf16.mxu0 %v4716_v56 }
 0x285   : > { %1475 = vmatpush1.bf16.msra.mxu0 %v4714_v57 }
 0x286   : > { %1476 = vmatprep.subr.bf16.mxu0 %v4719_v58 }
 0x289   : > { %1477 = vmatpush1.bf16.msra.mxu0 %v4717_v59 }
 0x28a   : > { %1478 = vmatprep.subr.bf16.mxu0 %v4722_v60 }
 0x28d   : > { %1479 = vmatpush1.bf16.msra.mxu0 %v4720_v2 }
 0x28e   : > { %1480 = vmatprep.subr.bf16.mxu0 %v4725_v3 }
 0x291   : > { %1481 = vmatpush1.bf16.msra.mxu0 %v4723_v9  ;;  %v1037_v9 = vrot.slane %v881_v47, %v1036_v8 }
 0x292   : > { %1615 = vmatprep.subr.bf16.mxu0 %v4728_v10 }
 0x294   : > { %1499 = vmatmul.mubr.bf16.vlgmr.msra.gmra.mrb[4].mxu0 %v1384_v14 }
 0x295   : > { %1616 = vmatpush1.bf16.msra.mxu0 %v4726_v63  ;;  %1647 = vmatprep.mubr.bf16.mxu0 %v5048_v13 }
 0x296   : > { %1617 = vmatprep.subr.bf16.mxu0 %v4731_v62 }
 0x299   : > { %1618 = vmatpush1.bf16.msra.mxu0 %v4729_v15 }
 0x29a   : > { %1619 = vmatprep.subr.bf16.mxu0 %v4734_v16 }
 0x29d   : > { %1620 = vmatpush1.bf16.msra.mxu0 %v4732_v17 }
 0x29e   : > { %1621 = vmatprep.subr.bf16.mxu0 %v4737_v18 }
 0x2a1   : > { %1622 = vmatpush1.bf16.msra.mxu0 %v4735_v19 }
 0x2a2   : > { %1623 = vmatprep.subr.bf16.mxu0 %v4740_v20 }
 0x2a5   : > { %1624 = vmatpush1.bf16.msra.mxu0 %v4738_v21 }
 0x2a6   : > { %1625 = vmatprep.subr.bf16.mxu0 %v4743_v22 }
 0x2a9   : > { %1626 = vmatpush1.bf16.msra.mxu0 %v4741_v23 }
 0x2aa   : > { %1627 = vmatprep.subr.bf16.mxu0 %v4746_v24  ;;  %v4774_v24 = vld [vmem:[%s6278_s7 + $0x80] ss:$8 sps:$4 sm:$0xff]  }
 0x2ad   : > { %1628 = vmatpush1.bf16.msra.mxu0 %v4744_v25 }
 0x2ae   : > { %1629 = vmatprep.subr.bf16.mxu0 %v4749_v26 }
 0x2b1   : > { %1630 = vmatpush1.bf16.msra.mxu0 %v4747_v27 }
 0x2b2   : > { %4346 = vmatprep.subr.bf16.mxu0 %v5046_v1 }
 0x2b4   : > { %1648 = vmatmul.mubr.bf16.vlgmr.msra.gmra.mrb[4].mxu0 %v5355_v7  ;;  %v4753_v7 = vld [vmem:[%s6278_s7 + $0x10] ss:$8 sps:$4 sm:$0xff]  }
 0x2b5   : > { %4362 = vmatprep.mubr.msk.bf16.mxu0 %vm5047_vm0, %v5046_v1  ;;  %1795 = vmatpush1.bf16.msra.mxu1 %v4753_v7 }
 0x2b6   : > { %1796 = vmatprep.subr.bf16.mxu1 %v4758_v31  ;;  %v4782_v31 = vld [vmem:[%s6278_s7 + $0xa4] ss:$8 sps:$4 sm:$0xff]  }
 0x2b9   : > { %1797 = vmatpush1.bf16.msra.mxu1 %v4756_v32 }
 0x2ba   : > { %1798 = vmatprep.subr.bf16.mxu1 %v4761_v33  ;;  %v4785_v33 = vld [vmem:[%s6278_s7 + $0xb4] ss:$8 sps:$4 sm:$0xff]  }
 0x2bd   : > { %1799 = vmatpush1.bf16.msra.mxu1 %v4759_v34  ;;  %v4783_v34 = vld [vmem:[%s6278_s7 + $0xb0] ss:$8 sps:$4 sm:$0xff]  }
 0x2be   : > { %1800 = vmatprep.subr.bf16.mxu1 %v4764_v35  ;;  %v4788_v35 = vld [vmem:[%s6278_s7 + $0xc4] ss:$8 sps:$4 sm:$0xff]  }
 0x2c1   : > { %1801 = vmatpush1.bf16.msra.mxu1 %v4762_v36  ;;  %v4786_v36 = vld [vmem:[%s6278_s7 + $0xc0] ss:$8 sps:$4 sm:$0xff]  }
 0x2c2   : > { %1802 = vmatprep.subr.bf16.mxu1 %v4767_v37  ;;  %v4791_v37 = vld [vmem:[%s6278_s7 + $0xd4] ss:$8 sps:$4 sm:$0xff]  }
 0x2c5   : > { %1803 = vmatpush1.bf16.msra.mxu1 %v4765_v38  ;;  %v4789_v38 = vld [vmem:[%s6278_s7 + $0xd0] ss:$8 sps:$4 sm:$0xff]  }
 0x2c6   : > { %1804 = vmatprep.subr.bf16.mxu1 %v4770_v39  ;;  %v4794_v39 = vld [vmem:[%s6278_s7 + $0xe4] ss:$8 sps:$4 sm:$0xff]  }
 0x2c9   : > { %1805 = vmatpush1.bf16.msra.mxu1 %v4768_v40 }
 0x2ca   : > { %1806 = vmatprep.subr.bf16.mxu1 %v4773_v41  ;;  %v4792_v41 = vld [vmem:[%s6278_s7 + $0xe0] ss:$8 sps:$4 sm:$0xff]  }
 0x2cd   : > { %1807 = vmatpush1.bf16.msra.mxu1 %v4771_v42  ;;  %v4797_v42 = vld [vmem:[%s6278_s7 + $0xf4] ss:$8 sps:$4 sm:$0xff]  }
 0x2ce   : > { %1961 = vmatprep.subr.bf16.mxu1 %v4776_v43 }
 0x387   : > { %v1649_v49 = vpop.f32.mrb[4].mxu0 }
 0x388   : > { %v1651_v50 = vpop.f32.mrb[5].mxu0  ;;  %v4534_v12 = vadd.f32 %v1649_v49, %v1037_v9  ;;  %v4800_v49 = vld [vmem:[%s6278_s7 + $0x104] ss:$8 sps:$4 sm:$0xff]  }
 0x389   : > { %v4535_v52 = vadd.f32 %v1651_v50, %v1041_v48  ;;  %v1653_v53 = vpop.f32.mrb[6].mxu0 }
 0x38a   : > { %v1655_v54 = vpop.f32.mrb[7].mxu0  ;;  %v4536_v16 = vadd.f32 %v1653_v53, %v1037_v9  ;;  %v4798_v53 = vld [vmem:[%s6278_s7 + $0x100] ss:$8 sps:$4 sm:$0xff]  }
 0x38b   : > { %v1662_v56 = vand.u32 2147483647, %v4535_v52  ;;  %v4537_v57 = vadd.f32 %v1655_v54, %v1041_v48  ;;  %vm1670_vm14 = vcmp.ge.f32.partialorder %v4535_v52, 0.0  ;;  %v4803_v54 = vld [vmem:[%s6278_s7 + $0x114] ss:$8 sps:$4 sm:$0xff]  }
 0x38c   : > { %v4816_v9 = vld [vmem:[%s6278_s7 + $0x160] ss:$8 sps:$4 sm:$0xff]  }
 0x38d   : > { %v1664_v58 = vsub.f32 0.0, %v1662_v56  ;;  %v1663_v59 = vand.u32 2147483647, %v4537_v57  ;;  %vm1671_vm15 = vcmp.ge.f32.partialorder %v4537_v57, 0.0  ;;  %v4801_v57 = vld [vmem:[%s6278_s7 + $0x110] ss:$8 sps:$4 sm:$0xff]  }
 0x38f   : > { %v1666_v60 = vmul.f32 1.442695, %v1664_v58  ;;  %v1665_v0 = vsub.f32 0.0, %v1663_v59  ;;  %v4806_v58 = vld [vmem:[%s6278_s7 + $0x124] ss:$8 sps:$4 sm:$0xff]  }
 0x390   : > { %v4804_v59 = vld [vmem:[%s6278_s7 + $0x120] ss:$8 sps:$4 sm:$0xff]  }
 0x391   : > { %4950 = vpow2.f32 %v1666_v60  ;;  %v1668_v2 = vmul.f32 1.442695, %v1665_v0  ;;  %v4809_v60 = vld [vmem:[%s6278_s7 + $0x134] ss:$8 sps:$4 sm:$0xff]   ;;  %v4807_v0 = vld [vmem:[%s6278_s7 + $0x130] ss:$8 sps:$4 sm:$0xff]  }
 0x393   : > { %4952 = vpow2.f32 %v1668_v2  ;;  %v4812_v2 = vld [vmem:[%s6278_s7 + $0x144] ss:$8 sps:$4 sm:$0xff]  }
 0x39b   : > { %v4951_v3 = vpop.eup %4950 }
 0x39c   : > { %v1674_v4 = vadd.f32 1.0, %v4951_v3  ;;  %v1672_v11 = vsel %vm1670_vm14, 1.0, %v4951_v3  ;;  %v4810_v3 = vld [vmem:[%s6278_s7 + $0x140] ss:$8 sps:$4 sm:$0xff]  }
 0x39d   : > { %v4953_v5 = vpop.eup %4952 }
 0x39e   : > { %4954 = vrcp.f32 %v1674_v4  ;;  %v1675_v6 = vadd.f32 1.0, %v4953_v5  ;;  %v1673_v14 = vsel %vm1671_vm15, 1.0, %v4953_v5  ;;  %v4815_v4 = vld [vmem:[%s6278_s7 + $0x154] ss:$8 sps:$4 sm:$0xff]   ;;  %v4813_v5 = vld [vmem:[%s6278_s7 + $0x150] ss:$8 sps:$4 sm:$0xff]  }
 0x3a0   : > { %4956 = vrcp.f32 %v1675_v6  ;;  %v4818_v6 = vld [vmem:[%s6278_s7 + $0x164] ss:$8 sps:$4 sm:$0xff]  }
 0x3a8   : > { %v4955_v10 = vpop.eup %4954 }
 0x3a9   : > { %v1677_v63 = vmul.f32 %v4955_v10, %v1672_v11  ;;  %v4821_v10 = vld [vmem:[%s6278_s7 + $0x174] ss:$8 sps:$4 sm:$0xff]   ;;  %v4819_v11 = vld [vmem:[%s6278_s7 + $0x170] ss:$8 sps:$4 sm:$0xff]  }
 0x3aa   : > { %v4957_v62 = vpop.eup %4956 }
 0x3ab   : > { %v1680_v15 = vmul.f32 %v4534_v12, %v1677_v63  ;;  %v1679_v17 = vmul.f32 %v4957_v62, %v1673_v14  ;;  %v4824_v12 = vld [vmem:[%s6278_s7 + $0x184] ss:$8 sps:$4 sm:$0xff]   ;;  %v4822_v14 = vld [vmem:[%s6278_s7 + $0x180] ss:$8 sps:$4 sm:$0xff]  }
 0x3ad   : > { %v5625_v18 = vadd.f32 %v1680_v15, %v5319_v51  ;;  %v1681_v19 = vmul.f32 %v4536_v16, %v1679_v17  ;;  %v4827_v15 = vld [vmem:[%s6278_s7 + $0x194] ss:$8 sps:$4 sm:$0xff]   ;;  %v4825_v17 = vld [vmem:[%s6278_s7 + $0x190] ss:$8 sps:$4 sm:$0xff]  }
 0x3af   : > { %v1687_v20 = vrot.slane %v5625_v18, 6  ;;  %v5629_v21 = vadd.f32 %v1681_v19, %v5322_v55  ;;  %v4779_v55 = vld [vmem:[%s6278_s7 + $0x94] ss:$8 sps:$4 sm:$0xff]   ;;  %v4830_v19 = vld [vmem:[%s6278_s7 + $0x1a4] ss:$8 sps:$4 sm:$0xff]  }
 0x3b1   : > { %v1688_v22 = vrot.slane %v5629_v21, 6  ;;  %v1693_v26 = vsel %vm884_vm6, 0.0, %v1687_v20 }
 0x3b3   : > { %v1694_v23 = vsel %vm884_vm6, %v1688_v22, 0.0  ;;  %v1689_v25 = vsel %vm884_vm6, %v1687_v20, %v1688_v22  ;;  %v4833_v22 = vld [vmem:[%s6278_s7 + $0x1b4] ss:$8 sps:$4 sm:$0xff]  }
 0x3b4   : > { %v5638_v51 = vpack.c.bf16 %v1694_v23, %v1694_v23  ;;  %v5640_v27 = vpack.c.bf16 %v1689_v25, %v1693_v26  ;;  %v3945_v28 = vpack.c.bf16 %v1689_v25, %v1687_v20  ;;  %v4828_v20 = vld [vmem:[%s6278_s7 + $0x1a0] ss:$8 sps:$4 sm:$0xff]   ;;  %v4831_v23 = vld [vmem:[%s6278_s7 + $0x1b0] ss:$8 sps:$4 sm:$0xff]   ;;  %v4839_v26 = vld [vmem:[%s6278_s7 + $0x1d4] ss:$8 sps:$4 sm:$0xff]  }
 0x3b5   : > { %v4834_v25 = vld [vmem:[%s6278_s7 + $0x1c0] ss:$8 sps:$4 sm:$0xff]  }
 0x3b6   : > { %3946 = vmatmul.mubr.msk.bf16.vlgmr.msra.gmra.mrb[4].mxu1 %vm5332_vm9, %v3945_v28  ;;  %v2329_v30 = vrot.slane %v5640_v27, 2  ;;  %v2330_v7 = vrot.slane %v5638_v51, 2  ;;  %v1871_v40 = vshll.u32 %v5640_v27, 16  ;;  %v1869_v47 = vshrl.u32 %v5640_v27, 16  ;;  %v4837_v28 = vld [vmem:[%s6278_s7 + $0x1d0] ss:$8 sps:$4 sm:$0xff]  }
 0x3b7   : > { %1962 = vmatpush1.bf16.msra.mxu1 %v4774_v24  ;;  %1993 = vmatprep.mubr.bf16.mxu1 %v5048_v13  ;;  %v1876_v48 = vshll.u32 %v5638_v51, 16  ;;  %v2027_v63 = vrot.slane %v5640_v27, 1  ;;  %v2028_v62 = vrot.slane %v5638_v51, 1  ;;  %v4836_v24 = vld [vmem:[%s6278_s7 + $0x1c4] ss:$8 sps:$4 sm:$0xff]  }
 0x3b8   : > { %1963 = vmatprep.subr.bf16.mxu1 %v4779_v55  ;;  %v5657_v32 = vsel %vm1530_vm10, %v2329_v30, %v2330_v7  ;;  %v1873_v43 = vrot.slane %v1871_v40, 1  ;;  %v4842_v55 = vld [vmem:[%s6278_s7 + $0x1e4] ss:$8 sps:$4 sm:$0xff]   ;;  %v4840_v30 = vld [vmem:[%s6278_s7 + $0x1e0] ss:$8 sps:$4 sm:$0xff]  }
 0x3b9   : > { %v1878_v52 = vrot.slane %v1876_v48, 1  ;;  %v2029_v16 = vsel %vm1226_vm12, %v2027_v63, %v2028_v62  ;;  %v4845_v7 = vld [vmem:[%s6278_s7 + $0x1f4] ss:$8 sps:$4 sm:$0xff]   ;;  %v4846_v27 = vld [vmem:[%s6278_s7 + $0x200] ss:$8 sps:$4 sm:$0xff]  }
 0x3ba   : > { %v1874_v50 = vor.u32 %v1873_v43, %v1869_v47  ;;  %v4857_v43 = vld [vmem:[%s6278_s7 + $0x234] ss:$8 sps:$4 sm:$0xff]   ;;  %v1684_v63 = vld [vmem:[%s6279_s8] sm:$0x3] }
 0x3bb   : > { %1964 = vmatpush1.bf16.msra.mxu1 %v4777_v29  ;;  %v2178_v29 = vshrl.u32 %v5638_v51, 16  ;;  %v4851_v51 = vld [vmem:[%s6278_s7 + $0x214] ss:$8 sps:$4 sm:$0xff]   ;;  %v1843_v62 = vrot.slane %v1684_v63, %v1040_v46  ;;  %v1839_v46 = vrot.slane %v1684_v63, %v1036_v8 }
 0x3bc   : > { %1965 = vmatprep.subr.bf16.mxu1 %v4782_v31  ;;  %v1879_v56 = vsel %vm1066_vm11, %v1874_v50, %v1878_v52  ;;  %v2175_v31 = vrot.slane %v1869_v47, 1  ;;  %v4858_v47 = vld [vmem:[%s6278_s7 + $0x240] ss:$8 sps:$4 sm:$0xff]   ;;  %v4866_v50 = vld [vmem:[%s6278_s7 + $0x264] ss:$8 sps:$4 sm:$0xff]  }
 0x3bd   : > { %v4864_v52 = vld [vmem:[%s6278_s7 + $0x260] ss:$8 sps:$4 sm:$0xff]  }
 0x3bf   : > { %1966 = vmatpush1.bf16.msra.mxu1 %v4780_v61  ;;  %v2176_v61 = vrot.slane %v1871_v40, 2  ;;  %v4849_v40 = vld [vmem:[%s6278_s7 + $0x210] ss:$8 sps:$4 sm:$0xff]  }
 0x3c0   : > { %1967 = vmatprep.subr.bf16.mxu1 %v4785_v33  ;;  %v2180_v33 = vrot.slane %v2178_v29, 1 }
 0x3c3   : > { %1968 = vmatpush1.bf16.msra.mxu1 %v4783_v34  ;;  %v2181_v34 = vrot.slane %v1876_v48, 2  ;;  %v4863_v48 = vld [vmem:[%s6278_s7 + $0x254] ss:$8 sps:$4 sm:$0xff]  }
 0x3c4   : > { %1969 = vmatprep.subr.bf16.mxu1 %v4788_v35  ;;  %v4843_v35 = vld [vmem:[%s6278_s7 + $0x1f0] ss:$8 sps:$4 sm:$0xff]  }
 0x3c7   : > { %1970 = vmatpush1.bf16.msra.mxu1 %v4786_v36  ;;  %v4848_v36 = vld [vmem:[%s6278_s7 + $0x204] ss:$8 sps:$4 sm:$0xff]  }
 0x3c8   : > { %1971 = vmatprep.subr.bf16.mxu1 %v4791_v37  ;;  %v2177_v37 = vor.u32 %v2176_v61, %v2175_v31 }
 0x3cb   : > { %1972 = vmatpush1.bf16.msra.mxu1 %v4789_v38  ;;  %v2182_v38 = vor.u32 %v2181_v34, %v2180_v33 }
 0x3cc   : > { %1973 = vmatprep.subr.bf16.mxu1 %v4794_v39 }
 0x3cd   : > { %v2183_v39 = vsel %vm1375_vm13, %v2177_v37, %v2182_v38 }
 0x3cf   : > { %1974 = vmatpush1.bf16.msra.mxu1 %v4792_v41  ;;  %v4854_v41 = vld [vmem:[%s6278_s7 + $0x224] ss:$8 sps:$4 sm:$0xff]  }
 0x3d0   : > { %1975 = vmatprep.subr.bf16.mxu1 %v4797_v42  ;;  %v4852_v42 = vld [vmem:[%s6278_s7 + $0x220] ss:$8 sps:$4 sm:$0xff]  }
 0x3d3   : > { %1976 = vmatpush1.bf16.msra.mxu1 %v4795_v44  ;;  %v4860_v44 = vld [vmem:[%s6278_s7 + $0x244] ss:$8 sps:$4 sm:$0xff]  }
 0x3d4   : > { %2111 = vmatprep.subr.bf16.mxu1 %v4800_v49  ;;  %v4861_v49 = vld [vmem:[%s6278_s7 + $0x250] ss:$8 sps:$4 sm:$0xff]  }
 0x3d6   : > { %1994 = vmatmul.mubr.bf16.vlgmr.msra.gmra.mrb[4].mxu1 %v1879_v56  ;;  %v4870_v56 = vld [vmem:[%s6280_s9] sm:$0xff]  }
 0x3d7   : > { %2112 = vmatpush1.bf16.msra.mxu1 %v4798_v53  ;;  %2143 = vmatprep.mubr.bf16.mxu1 %v5048_v13  ;;  %v4869_v53 = vld [vmem:[%s6278_s7 + $0x274] ss:$8 sps:$4 sm:$0xff]  }
 0x3d8   : > { %2113 = vmatprep.subr.bf16.mxu1 %v4803_v54  ;;  %v4867_v54 = vld [vmem:[%s6278_s7 + $0x270] ss:$8 sps:$4 sm:$0xff]   ;;  %4347 = vmatpush3.bf16.msra.mxu0 %v4870_v56 }
 0x3d9   : > { %4348 = vmatprep.subr.bf16.mxu0 %v5046_v1  ;;  %v4901_v56 = vld [vmem:[%s6282_s11 + $0x78] sm:$0xff]  }
 0x3db   : > { %2114 = vmatpush1.bf16.msra.mxu1 %v4801_v57  ;;  %v4871_v57 = vld [vmem:[%s6282_s11] sm:$0xff]  }
 0x3dc   : > { %2115 = vmatprep.subr.bf16.mxu1 %v4806_v58  ;;  %v4872_v58 = vld [vmem:[%s6280_s9 + $0x8] sm:$0xff]  }
 0x3dd   : > { %4349 = vmatpush3.bf16.msra.mxu0 %v4872_v58 }
 0x3de   : > { %4350 = vmatprep.subr.bf16.mxu0 %v5046_v1 }
 0x3df   : > { %2116 = vmatpush1.bf16.msra.mxu1 %v4804_v59  ;;  %v4874_v59 = vld [vmem:[%s6280_s9 + $0x10] sm:$0xff]  }
 0x3e0   : > { %2117 = vmatprep.subr.bf16.mxu1 %v4809_v60  ;;  %v4875_v60 = vld [vmem:[%s6282_s11 + $0x10] sm:$0xff]  }
 0x3e1   : > { %4351 = vmatpush3.bf16.msra.mxu0 %v4874_v59 }
 0x3e2   : > { %4352 = vmatprep.subr.bf16.mxu0 %v5046_v1 }
 0x3e3   : > { %2118 = vmatpush1.bf16.msra.mxu1 %v4807_v0  ;;  %v4876_v0 = vld [vmem:[%s6280_s9 + $0x18] sm:$0xff]  }
 0x3e4   : > { %2119 = vmatprep.subr.bf16.mxu1 %v4812_v2  ;;  %v4877_v2 = vld [vmem:[%s6282_s11 + $0x18] sm:$0xff]  }
 0x3e5   : > { %4353 = vmatpush3.bf16.msra.mxu0 %v4876_v0 }
 0x3e6   : > { %4354 = vmatprep.subr.bf16.mxu0 %v5046_v1 }
 0x3e7   : > { %2120 = vmatpush1.bf16.msra.mxu1 %v4810_v3  ;;  %v4878_v3 = vld [vmem:[%s6280_s9 + $0x20] sm:$0xff]  }
 0x3e8   : > { %2121 = vmatprep.subr.bf16.mxu1 %v4815_v4  ;;  %v4879_v4 = vld [vmem:[%s6282_s11 + $0x20] sm:$0xff]  }
 0x3e9   : > { %4355 = vmatpush3.bf16.msra.mxu0 %v4878_v3 }
 0x3ea   : > { %4356 = vmatprep.subr.bf16.mxu0 %v5046_v1 }
 0x3eb   : > { %2122 = vmatpush1.bf16.msra.mxu1 %v4813_v5  ;;  %v4880_v5 = vld [vmem:[%s6280_s9 + $0x28] sm:$0xff]  }
 0x3ec   : > { %2123 = vmatprep.subr.bf16.mxu1 %v4818_v6  ;;  %v4881_v6 = vld [vmem:[%s6282_s11 + $0x28] sm:$0xff]  }
 0x3ed   : > { %4357 = vmatpush3.bf16.msra.mxu0 %v4880_v5 }
 0x3ee   : > { %4358 = vmatprep.subr.bf16.mxu0 %v5046_v1 }
 0x3ef   : > { %2124 = vmatpush1.bf16.msra.mxu1 %v4816_v9  ;;  %v4882_v9 = vld [vmem:[%s6280_s9 + $0x30] sm:$0xff]  }
 0x3f0   : > { %2125 = vmatprep.subr.bf16.mxu1 %v4821_v10  ;;  %v4883_v10 = vld [vmem:[%s6282_s11 + $0x30] sm:$0xff]  }
 0x3f1   : > { %4359 = vmatpush3.bf16.msra.mxu0 %v4882_v9 }
 0x3f2   : > { %4360 = vmatprep.subr.bf16.mxu0 %v5046_v1 }
 0x3f3   : > { %2126 = vmatpush1.bf16.msra.mxu1 %v4819_v11  ;;  %v4884_v11 = vld [vmem:[%s6280_s9 + $0x38] sm:$0xff]  }
 0x3f4   : > { %2265 = vmatprep.subr.bf16.mxu1 %v4824_v12  ;;  %v4885_v12 = vld [vmem:[%s6282_s11 + $0x38] sm:$0xff]  }
 0x3f5   : > { %4361 = vmatpush3.bf16.msra.mxu0 %v4884_v11 }
 0x3f6   : > { %2144 = vmatmul.mubr.bf16.vlgmr.msra.gmra.mrb[4].mxu1 %v2029_v16  ;;  %4386 = vmatprep.subr.bf16.mxu0 %v5046_v1 }
 0x3f7   : > { %2266 = vmatpush1.bf16.msra.mxu1 %v4822_v14  ;;  %2297 = vmatprep.mubr.bf16.mxu1 %v5048_v13 }
 0x3f8   : > { %2267 = vmatprep.subr.bf16.mxu1 %v4827_v15 }
 0x3fb   : > { %2268 = vmatpush1.bf16.msra.mxu1 %v4825_v17 }
 0x3fc   : > { %2269 = vmatprep.subr.bf16.mxu1 %v4830_v19 }
 0x3ff   : > { %2270 = vmatpush1.bf16.msra.mxu1 %v4828_v20 }
 0x400   : > { %2271 = vmatprep.subr.bf16.mxu1 %v4833_v22 }
 0x403   : > { %2272 = vmatpush1.bf16.msra.mxu1 %v4831_v23 }
 0x404   : > { %2273 = vmatprep.subr.bf16.mxu1 %v4836_v24 }
 0x407   : > { %2274 = vmatpush1.bf16.msra.mxu1 %v4834_v25 }
 0x408   : > { %2275 = vmatprep.subr.bf16.mxu1 %v4839_v26 }
 0x40b   : > { %2276 = vmatpush1.bf16.msra.mxu1 %v4837_v28 }
 0x40c   : > { %2277 = vmatprep.subr.bf16.mxu1 %v4842_v55 }
 0x40f   : > { %2278 = vmatpush1.bf16.msra.mxu1 %v4840_v30 }
 0x410   : > { %2279 = vmatprep.subr.bf16.mxu1 %v4845_v7 }
 0x413   : > { %2280 = vmatpush1.bf16.msra.mxu1 %v4843_v35 }
 0x414   : > { %2413 = vmatprep.subr.bf16.mxu1 %v4848_v36 }
 0x416   : > { %2298 = vmatmul.mubr.bf16.vlgmr.msra.gmra.mrb[4].mxu1 %v2183_v39 }
 0x417   : > { %2414 = vmatpush1.bf16.msra.mxu1 %v4846_v27  ;;  %2445 = vmatprep.mubr.bf16.mxu1 %v5048_v13  ;;  %v4855_v13 = vld [vmem:[%s6278_s7 + $0x230] ss:$8 sps:$4 sm:$0xff]  }
 0x418   : > { %2415 = vmatprep.subr.bf16.mxu1 %v4851_v51 }
 0x41b   : > { %2416 = vmatpush1.bf16.msra.mxu1 %v4849_v40 }
 0x41c   : > { %2417 = vmatprep.subr.bf16.mxu1 %v4854_v41  ;;  %v4889_v41 = vld [vmem:[%s6284_s13 + $0x18] sm:$0xff]  }
 0x41f   : > { %2418 = vmatpush1.bf16.msra.mxu1 %v4852_v42  ;;  %v4890_v42 = vld [vmem:[%s6284_s13 + $0x20] sm:$0xff]  }
 0x420   : > { %2419 = vmatprep.subr.bf16.mxu1 %v4857_v43  ;;  %v4891_v43 = vld [vmem:[%s6284_s13 + $0x28] sm:$0xff]  }
 0x423   : > { %2420 = vmatpush1.bf16.msra.mxu1 %v4855_v13  ;;  %v4892_v13 = vld [vmem:[%s6284_s13 + $0x30] sm:$0xff]  }
 0x424   : > { %2421 = vmatprep.subr.bf16.mxu1 %v4860_v44  ;;  %v4893_v44 = vld [vmem:[%s6284_s13 + $0x38] sm:$0xff]  }
 0x427   : > { %2422 = vmatpush1.bf16.msra.mxu1 %v4858_v47  ;;  %v4894_v47 = vld [vmem:[%s6282_s11 + $0x40] sm:$0xff]  }
 0x428   : > { %2423 = vmatprep.subr.bf16.mxu1 %v4863_v48  ;;  %v4895_v48 = vld [vmem:[%s6282_s11 + $0x48] sm:$0xff]  }
 0x42b   : > { %2424 = vmatpush1.bf16.msra.mxu1 %v4861_v49  ;;  %v4896_v49 = vld [vmem:[%s6282_s11 + $0x50] sm:$0xff]  }
 0x42c   : > { %2425 = vmatprep.subr.bf16.mxu1 %v4866_v50  ;;  %v4897_v50 = vld [vmem:[%s6282_s11 + $0x58] sm:$0xff]  }
 0x42f   : > { %2426 = vmatpush1.bf16.msra.mxu1 %v4864_v52  ;;  %v4898_v52 = vld [vmem:[%s6282_s11 + $0x60] sm:$0xff]  }
 0x430   : > { %2427 = vmatprep.subr.bf16.mxu1 %v4869_v53  ;;  %v4899_v53 = vld [vmem:[%s6282_s11 + $0x68] sm:$0xff]  }
 0x433   : > { %2428 = vmatpush1.bf16.msra.mxu1 %v4867_v54  ;;  %v4900_v54 = vld [vmem:[%s6282_s11 + $0x70] sm:$0xff]  }
 0x434   : > { %4366 = vmatprep.subr.bf16.mxu1 %v5046_v1 }
 0x436   : > { %2446 = vmatmul.mubr.bf16.vlgmr.msra.gmra.mrb[4].mxu1 %v5657_v32  ;;  %v4873_v32 = vld [vmem:[%s6282_s11 + $0x8] sm:$0xff]  }
 0x437   : > { %4382 = vmatprep.mubr.msk.bf16.mxu1 %vm5047_vm0, %v5046_v1  ;;  %4367 = vmatpush3.bf16.msra.mxu1 %v4871_v57  ;;  %v4075_v57 = vld [vmem:[%s6281_s10] ss:$0 sm:$0xff] }
 0x438   : > { %4368 = vmatprep.subr.bf16.mxu1 %v5046_v1 }
 0x43b   : > { %4369 = vmatpush3.bf16.msra.mxu1 %v4873_v32  ;;  %v4084_v32 = vld [vmem:[%s6283_s12] ss:$0 sm:$0xff] }
 0x43c   : > { %4370 = vmatprep.subr.bf16.mxu1 %v5046_v1 }
 0x43f   : > { %4371 = vmatpush3.bf16.msra.mxu1 %v4875_v60 }
 0x440   : > { %4372 = vmatprep.subr.bf16.mxu1 %v5046_v1 }
 0x443   : > { %4373 = vmatpush3.bf16.msra.mxu1 %v4877_v2 }
 0x444   : > { %4374 = vmatprep.subr.bf16.mxu1 %v5046_v1 }
 0x447   : > { %4375 = vmatpush3.bf16.msra.mxu1 %v4879_v4 }
 0x448   : > { %4376 = vmatprep.subr.bf16.mxu1 %v5046_v1 }
 0x44b   : > { %4377 = vmatpush3.bf16.msra.mxu1 %v4881_v6 }
 0x44c   : > { %4378 = vmatprep.subr.bf16.mxu1 %v5046_v1 }
 0x44f   : > { %4379 = vmatpush3.bf16.msra.mxu1 %v4883_v10 }
 0x450   : > { %4380 = vmatprep.subr.bf16.mxu1 %v5046_v1 }
 0x453   : > { %4381 = vmatpush3.bf16.msra.mxu1 %v4885_v12 }
 0x454   : > { %4406 = vmatprep.subr.bf16.mxu1 %v5046_v1 }
 0x509   : > { %v2447_v14 = vpop.f32.mrb[4].mxu1 }
 0x50a   : > { %v2449_v15 = vpop.f32.mrb[5].mxu1  ;;  %v4538_v33 = vadd.f32 %v2447_v14, %v1839_v46 }
 0x50b   : > { %v4539_v16 = vadd.f32 %v2449_v15, %v1843_v62  ;;  %v2451_v17 = vpop.f32.mrb[6].mxu1 }
 0x50c   : > { %v2453_v19 = vpop.f32.mrb[7].mxu1  ;;  %v4540_v38 = vadd.f32 %v2451_v17, %v1839_v46 }
 0x50d   : > { %v2460_v20 = vand.u32 2147483647, %v4539_v16  ;;  %v4541_v22 = vadd.f32 %v2453_v19, %v1843_v62  ;;  %vm2468_vm1 = vcmp.ge.f32.partialorder %v4539_v16, 0.0  ;;  %v4093_v16 = vld [vmem:[%s6285_s14] ss:$0 sm:$0xff] }
 0x50f   : > { %v2462_v23 = vsub.f32 0.0, %v2460_v20  ;;  %v2461_v24 = vand.u32 2147483647, %v4541_v22  ;;  %vm2469_vm2 = vcmp.ge.f32.partialorder %v4541_v22, 0.0 }
 0x511   : > { %v2464_v25 = vmul.f32 1.442695, %v2462_v23  ;;  %v2463_v26 = vsub.f32 0.0, %v2461_v24 }
 0x513   : > { %4958 = vpow2.f32 %v2464_v25  ;;  %v2466_v28 = vmul.f32 1.442695, %v2463_v26  ;;  %v4147_v26 = vld [vmem:[%s6283_s12 + $0x1] ss:$0 sm:$0xff] }
 0x515   : > { %4960 = vpow2.f32 %v2466_v28 }
 0x51d   : > { %v4959_v55 = vpop.eup %4958 }
 0x51e   : > { %v2472_v29 = vadd.f32 1.0, %v4959_v55  ;;  %v2470_v61 = vsel %vm2468_vm1, 1.0, %v4959_v55 }
 0x51f   : > { %v4961_v30 = vpop.eup %4960 }
 0x520   : > { %4962 = vrcp.f32 %v2472_v29  ;;  %v2473_v7 = vadd.f32 1.0, %v4961_v30  ;;  %v2471_v36 = vsel %vm2469_vm2, 1.0, %v4961_v30 }
 0x522   : > { %4964 = vrcp.f32 %v2473_v7 }
 0x52a   : > { %v4963_v31 = vpop.eup %4962 }
 0x52b   : > { %v2475_v34 = vmul.f32 %v4963_v31, %v2470_v61 }
 0x52c   : > { %v4965_v35 = vpop.eup %4964 }
 0x52d   : > { %v2478_v37 = vmul.f32 %v4538_v33, %v2475_v34  ;;  %v2477_v27 = vmul.f32 %v4965_v35, %v2471_v36 }
 0x52f   : > { %v2479_v51 = vmul.f32 %v4540_v38, %v2477_v27  ;;  %v5936_v39 = vadd.f32 %v2478_v37, %v5625_v18  ;;  %v4887_v18 = vld [vmem:[%s6284_s13 + $0x8] sm:$0xff]  }
 0x531   : > { %v5939_v40 = vadd.f32 %v2479_v51, %v5629_v21  ;;  %v4888_v21 = vld [vmem:[%s6284_s13 + $0x10] sm:$0xff]  }
 0x533   : > { %v5946_v8 = vpack.c.bf16 %v5939_v40, %v5936_v39 }
 0x535   : > { %4363 = vmatmul.mubr.bf16.vlgmr.msra.gmra.mrb[8].mxu0 %v5946_v8  ;;  %4383 = vmatmul.mubr.bf16.vlgmr.msra.gmra.mrb[8].mxu1 %v5946_v8 }
 0x536   : > { %4387 = vmatpush3.bf16.msra.mxu0 %v4886_v45  ;;  %4402 = vmatprep.mubr.msk.bf16.mxu0 %vm5047_vm0, %v5046_v1 }
 0x537   : > { %4388 = vmatprep.subr.bf16.mxu0 %v5046_v1  ;;  %4408 = vmatprep.mubr.msk.bf16.mxu1 %vm5047_vm0, %v5046_v1 }
 0x53a   : > { %4389 = vmatpush3.bf16.msra.mxu0 %v4887_v18 }
 0x53b   : > { %4390 = vmatprep.subr.bf16.mxu0 %v5046_v1 }
 0x53e   : > { %4391 = vmatpush3.bf16.msra.mxu0 %v4888_v21 }
 0x53f   : > { %4392 = vmatprep.subr.bf16.mxu0 %v5046_v1 }
 0x542   : > { %4393 = vmatpush3.bf16.msra.mxu0 %v4889_v41 }
 0x543   : > { %4394 = vmatprep.subr.bf16.mxu0 %v5046_v1 }
 0x546   : > { %4395 = vmatpush3.bf16.msra.mxu0 %v4890_v42 }
 0x547   : > { %4396 = vmatprep.subr.bf16.mxu0 %v5046_v1 }
 0x54a   : > { %4397 = vmatpush3.bf16.msra.mxu0 %v4891_v43 }
 0x54b   : > { %4398 = vmatprep.subr.bf16.mxu0 %v5046_v1 }
 0x54e   : > { %4399 = vmatpush3.bf16.msra.mxu0 %v4892_v13 }
 0x54f   : > { %4400 = vmatprep.subr.bf16.mxu0 %v5046_v1 }
 0x552   : > { %4401 = vmatpush3.bf16.msra.mxu0 %v4893_v44 }
 0x553   : > { %4438 = vmatprep.subr.bf16.mxu0 %v5046_v1 }
 0x555   : > { %4403 = vmatmul.mubr.bf16.vlgmr.msra.gmra.mrb[12].mxu0 %v5946_v8 }
 0x556   : > { %4439 = vmatpush3.bf16.msra.mxu0 %v4894_v47  ;;  %4454 = vmatprep.mubr.msk.bf16.mxu0 %vm5047_vm0, %v5046_v1 }
 0x557   : > { %4440 = vmatprep.subr.bf16.mxu0 %v5046_v1 }
 0x55a   : > { %4441 = vmatpush3.bf16.msra.mxu0 %v4895_v48 }
 0x55b   : > { %4442 = vmatprep.subr.bf16.mxu0 %v5046_v1 }
 0x55e   : > { %4443 = vmatpush3.bf16.msra.mxu0 %v4896_v49 }
 0x55f   : > { %4444 = vmatprep.subr.bf16.mxu0 %v5046_v1 }
 0x562   : > { %4445 = vmatpush3.bf16.msra.mxu0 %v4897_v50 }
 0x563   : > { %4446 = vmatprep.subr.bf16.mxu0 %v5046_v1 }
 0x566   : > { %4447 = vmatpush3.bf16.msra.mxu0 %v4898_v52 }
 0x567   : > { %4448 = vmatprep.subr.bf16.mxu0 %v5046_v1 }
 0x56a   : > { %4449 = vmatpush3.bf16.msra.mxu0 %v4899_v53  ;;  %v4902_v53 = vld [vmem:[%s6280_s9 + $0x40] sm:$0xff]  }
 0x56b   : > { %4450 = vmatprep.subr.bf16.mxu0 %v5046_v1 }
 0x56e   : > { %4451 = vmatpush3.bf16.msra.mxu0 %v4900_v54 }
 0x56f   : > { %4452 = vmatprep.subr.bf16.mxu0 %v5046_v1 }
 0x572   : > { %4453 = vmatpush3.bf16.msra.mxu0 %v4901_v56  ;;  %v4903_v56 = vld [vmem:[%s6280_s9 + $0x48] sm:$0xff]  }
 0x573   : > { %4484 = vmatprep.subr.bf16.mxu0 %v5046_v1 }
 0x575   : > { %4455 = vmatmul.mubr.bf16.vlgmr.msra.gmra.mrb[16].mxu0 %v5946_v8 }
 0x576   : > { %4486 = vmatprep.mubr.msk.bf16.mxu0 %vm5047_vm0, %v5046_v1 }
 0x608   : > { %v2588_v58 = vpop.f32.mrb[8].mxu0  ;;  %v2702_v59 = vpop.f32.mrb[8].mxu1 }
 0x609   : > { %v2589_v60 = vadd.f32 %v4075_v57, %v2588_v58  ;;  %v4364_v0 = vpop.f32.mrb[9].mxu0  ;;  %v4384_v2 = vpop.f32.mrb[9].mxu1  ;;  %v2703_v5 = vadd.f32 %v4084_v32, %v2702_v59  ;;  %v4905_v58 = vld [vmem:[%s6280_s9 + $0x58] sm:$0xff]   ;;  %v4907_v59 = vld [vmem:[%s6280_s9 + $0x68] sm:$0xff]  }
 0x60a   : > { %v2591_v3 = vpop.f32.mrb[10].mxu0  ;;  %v2705_v4 = vpop.f32.mrb[10].mxu1  ;;  %v4909_v0 = vld [vmem:[%s6280_s9 + $0x78] sm:$0xff]   ;;  %v4910_v2 = vld [vmem:[%s6284_s13 + $0x40] sm:$0xff]  }
 0x60b   : > { %v2592_v6 = vadd.f32 %v4075_v57, %v2591_v3  ;;  %v2706_v9 = vadd.f32 %v4084_v32, %v2705_v4  ;;  %v4365_v10 = vpop.f32.mrb[11].mxu0  ;;  %v4385_v11 = vpop.f32.mrb[11].mxu1  ;;  %v2595_v12 = vmul.f32 0.088388346, %v2589_v60  ;;  %v4904_v57 = vld [vmem:[%s6280_s9 + $0x50] sm:$0xff]   ;;  %v4906_v32 = vld [vmem:[%s6280_s9 + $0x60] sm:$0xff]  }
 0x60c   : > { %v4908_v60 = vld [vmem:[%s6280_s9 + $0x70] sm:$0xff]   ;;  %v4911_v3 = vld [vmem:[%s6284_s13 + $0x48] sm:$0xff]   ;;  %v4917_v11 = vld [vmem:[%s6284_s13 + $0x78] sm:$0xff]  }
 0x60d   : > { %v2596_v63 = vmul.f32 0.088388346, %v2592_v6  ;;  %v2822_v62 = vpack.c.bf16 %v2706_v9, %v2703_v5  ;;  %v4912_v4 = vld [vmem:[%s6284_s13 + $0x50] sm:$0xff]   ;;  %v4913_v5 = vld [vmem:[%s6284_s13 + $0x58] sm:$0xff]   ;;  %v4914_v6 = vld [vmem:[%s6284_s13 + $0x60] sm:$0xff]  }
 0x60e   : > { %v4915_v9 = vld [vmem:[%s6284_s13 + $0x68] sm:$0xff]   ;;  %v4916_v10 = vld [vmem:[%s6284_s13 + $0x70] sm:$0xff]  }
 0x60f   : > { %v2821_v14 = vpack.c.bf16 %v2596_v63, %v2595_v12  ;;  %v2828_v15 = vsel %vm2823_vm3, %v2822_v62, 0 }
 0x610   : > { %4407 = vmatpush3.bf16.xpose.msra.mxu1 %v2828_v15 }
 0x611   : > { %4412 = vmatprep.subr.bf16.mxu1 %v5046_v1 }
 0x617   : > { %4409 = vmatmul.mubr.msk.bf16.vlgmr.msra.gmra.mrb[12].mxu1 %vm2823_vm3, %v2821_v14 }
 0x618   : > { %4414 = vmatprep.mubr.msk.bf16.mxu1 %vm5047_vm0, %v5046_v1 }
 0x628   : > { %v2814_v17 = vpop.f32.mrb[12].mxu0 }
 0x629   : > { %v4404_v19 = vpop.f32.mrb[13].mxu0  ;;  %v2815_v22 = vadd.f32 %v4093_v16, %v2814_v17 }
 0x62a   : > { %v2817_v20 = vpop.f32.mrb[14].mxu0 }
 0x62b   : > { %v2818_v23 = vadd.f32 %v4093_v16, %v2817_v20  ;;  %v4405_v24 = vpop.f32.mrb[15].mxu0 }
 0x62d   : > { %v2895_v25 = vpack.c.bf16 %v2818_v23, %v2815_v22 }
 0x62f   : > { %4413 = vmatpush3.bf16.msra.mxu1 %v2895_v25 }
 0x630   : > { %4418 = vmatprep.subr.bf16.mxu1 %v5046_v1 }
 0x648   : > { %v3172_v28 = vpop.f32.mrb[16].mxu0 }
 0x649   : > { %v4456_v55 = vpop.f32.mrb[17].mxu0  ;;  %v6039_v30 = vadd.f32 %v4147_v26, %v3172_v28  ;;  %v4918_v28 = vld [vmem:[%s6286_s15] sm:$0xff]  }
 0x64a   : > { %v3175_v29 = vpop.f32.mrb[18].mxu0 }
 0x64b   : > { %v6041_v7 = vadd.f32 %v4147_v26, %v3175_v29  ;;  %v4457_v46 = vpop.f32.mrb[19].mxu0  ;;  %v4919_v29 = vld [vmem:[%s6286_s15 + $0x8] sm:$0xff]  }
 0x64c   : > { %v4173_v46 = vld [vmem:[%s6285_s14 + $0x1] ss:$0 sm:$0xff] }
 0x64d   : > { %v3294_v31 = vpack.c.bf16 %v6041_v7, %v6039_v30  ;;  %v4920_v30 = vld [vmem:[%s6286_s15 + $0x10] sm:$0xff]   ;;  %v4921_v7 = vld [vmem:[%s6286_s15 + $0x18] sm:$0xff]  }
 0x64f   : > { %v3299_v12 = vsel %vm2823_vm3, %v3294_v31, 0 }
 0x6ea   : > { %v2864_v61 = vpop.f32.mrb[12].mxu1 }
 0x6eb   : > { %v4410_v33 = vpop.f32.mrb[13].mxu1  ;;  %v2872_v34 = vsel %vm2871_vm4, %v2864_v61, -inf }
 0x6ec   : > { %2873 = vmax.xlane.f32.xlu0 %v2872_v34  ;;  %v2867_v35 = vpop.f32.mrb[14].mxu1 }
 0x6ed   : > { %v4411_v36 = vpop.f32.mrb[15].mxu1  ;;  %v2875_v37 = vsel %vm2871_vm4, %v2867_v35, -inf }
 0x6f0   : > { %2876 = vmax.xlane.f32.xlu0 %v2875_v37 }
 0x779   : > { %v2874_v38 = vpop.xlane.xlu0 %2873 }
 0x77a   : > { %v2878_v27 = vsub.f32 %v2864_v61, %v2874_v38 }
 0x77c   : > { %v2880_v51 = vmul.f32 1.442695, %v2878_v27 }
 0x77d   : > { %v2877_v45 = vpop.xlane.xlu0 %2876 }
 0x77e   : > { %4966 = vpow2.f32 %v2880_v51  ;;  %v2879_v18 = vsub.f32 %v2867_v35, %v2877_v45 }
 0x780   : > { %v2882_v21 = vmul.f32 1.442695, %v2879_v18 }
 0x782   : > { %4968 = vpow2.f32 %v2882_v21 }
 0x788   : > { %v4967_v41 = vpop.eup %4966 }
 0x789   : > { %v2884_v42 = vsel %vm2871_vm4, %v4967_v41, 0.0 }
 0x78a   : > { %2885 = vadd.xlane.f32.xlu1 %v2884_v42 }
 0x78c   : > { %v4969_v43 = vpop.eup %4968 }
 0x78d   : > { %v2887_v13 = vsel %vm2871_vm4, %v4969_v43, 0.0 }
 0x78e   : > { %2888 = vadd.xlane.f32.xlu1 %v2887_v13 }
 0x817   : > { %v2886_v44 = vpop.xlane.xlu1 %2885 }
 0x818   : > { %4970 = vrcp.f32 %v2886_v44 }
 0x81b   : > { %v2889_v47 = vpop.xlane.xlu1 %2888 }
 0x81c   : > { %4972 = vrcp.f32 %v2889_v47 }
 0x822   : > { %v4971_v48 = vpop.eup %4970 }
 0x823   : > { %v2892_v50 = vmul.f32 %v4971_v48, %v4967_v41 }
 0x826   : > { %v4973_v49 = vpop.eup %4972 }
 0x827   : > { %v2893_v52 = vmul.f32 %v4973_v49, %v4969_v43 }
 0x829   : > { %v2894_v54 = vpack.c.bf16 %v2893_v52, %v2892_v50 }
 0x82b   : > { %4415 = vmatmul.mubr.msk.bf16.vlgmr.msra.gmra.mrb[16].mxu1 %vm2871_vm4, %v2894_v54 }
 0x82c   : > { %4419 = vmatpush3.bf16.msra.mxu1 %v4902_v53  ;;  %4434 = vmatprep.mubr.msk.bf16.mxu1 %vm5047_vm0, %v5046_v1 }
 0x82d   : > { %4420 = vmatprep.subr.bf16.mxu1 %v5046_v1 }
 0x830   : > { %4421 = vmatpush3.bf16.msra.mxu1 %v4903_v56 }
 0x831   : > { %4422 = vmatprep.subr.bf16.mxu1 %v5046_v1 }
 0x834   : > { %4423 = vmatpush3.bf16.msra.mxu1 %v4904_v57 }
 0x835   : > { %4424 = vmatprep.subr.bf16.mxu1 %v5046_v1 }
 0x838   : > { %4425 = vmatpush3.bf16.msra.mxu1 %v4905_v58 }
 0x839   : > { %4426 = vmatprep.subr.bf16.mxu1 %v5046_v1 }
 0x83c   : > { %4427 = vmatpush3.bf16.msra.mxu1 %v4906_v32 }
 0x83d   : > { %4428 = vmatprep.subr.bf16.mxu1 %v5046_v1 }
 0x840   : > { %4429 = vmatpush3.bf16.msra.mxu1 %v4907_v59 }
 0x841   : > { %4430 = vmatprep.subr.bf16.mxu1 %v5046_v1 }
 0x844   : > { %4431 = vmatpush3.bf16.msra.mxu1 %v4908_v60 }
 0x845   : > { %4432 = vmatprep.subr.bf16.mxu1 %v5046_v1 }
 0x848   : > { %4433 = vmatpush3.bf16.msra.mxu1 %v4909_v0 }
 0x849   : > { %4458 = vmatprep.subr.bf16.mxu1 %v5046_v1 }
 0x84b   : > { %4435 = vmatmul.mubr.bf16.vlgmr.msra.gmra.mrb[20].mxu1 %v5946_v8 }
 0x84c   : > { %4459 = vmatpush3.bf16.msra.mxu1 %v4910_v2  ;;  %4474 = vmatprep.mubr.msk.bf16.mxu1 %vm5047_vm0, %v5046_v1 }
 0x84d   : > { %4460 = vmatprep.subr.bf16.mxu1 %v5046_v1 }
 0x850   : > { %4461 = vmatpush3.bf16.msra.mxu1 %v4911_v3  ;;  %v4922_v3 = vld [vmem:[%s6286_s15 + $0x20] sm:$0xff]  }
 0x851   : > { %4462 = vmatprep.subr.bf16.mxu1 %v5046_v1 }
 0x854   : > { %4463 = vmatpush3.bf16.msra.mxu1 %v4912_v4 }
 0x855   : > { %4464 = vmatprep.subr.bf16.mxu1 %v5046_v1 }
 0x858   : > { %4465 = vmatpush3.bf16.msra.mxu1 %v4913_v5  ;;  %v4923_v5 = vld [vmem:[%s6286_s15 + $0x28] sm:$0xff]  }
 0x859   : > { %4466 = vmatprep.subr.bf16.mxu1 %v5046_v1 }
 0x85c   : > { %4467 = vmatpush3.bf16.msra.mxu1 %v4914_v6  ;;  %v4924_v6 = vld [vmem:[%s6286_s15 + $0x30] sm:$0xff]  }
 0x85d   : > { %4468 = vmatprep.subr.bf16.mxu1 %v5046_v1 }
 0x860   : > { %4469 = vmatpush3.bf16.msra.mxu1 %v4915_v9  ;;  %v4925_v9 = vld [vmem:[%s6286_s15 + $0x38] sm:$0xff]  }
 0x861   : > { %4470 = vmatprep.subr.bf16.mxu1 %v5046_v1 }
 0x864   : > { %4471 = vmatpush3.bf16.msra.mxu1 %v4916_v10 }
 0x865   : > { %4472 = vmatprep.subr.bf16.mxu1 %v5046_v1 }
 0x868   : > { %4473 = vmatpush3.bf16.msra.mxu1 %v4917_v11 }
 0x869   : > { %4478 = vmatprep.subr.bf16.mxu1 %v5046_v1 }
 0x86b   : > { %4475 = vmatmul.mubr.bf16.vlgmr.msra.gmra.mrb[24].mxu1 %v5946_v8  ;;  %v4121_v8 = vld [vmem:[%s6281_s10 + $0x1] ss:$0 sm:$0xff] }
 0x86c   : > { %4480 = vmatprep.mubr.msk.bf16.mxu1 %vm5047_vm0, %v5046_v1 }
 0x871   : > { %4479 = vmatpush3.bf16.xpose.msra.mxu1 %v3299_v12 }
 0x872   : > { %4502 = vmatprep.subr.bf16.mxu1 %v5046_v1 }
 0x8fe   : > { %v2933_v63 = vpop.f32.mrb[16].mxu1 }
 0x8ff   : > { %v4416_v62 = vpop.f32.mrb[17].mxu1 }
 0x900   : > { %v2936_v14 = vpop.f32.mrb[18].mxu1 }
 0x901   : > { %v2940_v15 = vpack.c.bf16 %v2936_v14, %v2933_v63  ;;  %v4417_v16 = vpop.f32.mrb[19].mxu1  ;;  %v4926_v63 = vld [vmem:[%s6288_s17] sm:$0xff]  }
 0x902   : > { %v4928_v16 = vld [vmem:[%s6288_s17 + $0x10] sm:$0xff]  }
 0x91e   : > { %v3056_v17 = vpop.f32.mrb[20].mxu1 }
 0x91f   : > { %v3057_v19 = vadd.f32 %v4121_v8, %v3056_v17  ;;  %v4436_v20 = vpop.f32.mrb[21].mxu1  ;;  %v4930_v17 = vld [vmem:[%s6288_s17 + $0x20] sm:$0xff]  }
 0x920   : > { %v3059_v22 = vpop.f32.mrb[22].mxu1  ;;  %v4932_v20 = vld [vmem:[%s6288_s17 + $0x30] sm:$0xff]  }
 0x921   : > { %v3060_v23 = vadd.f32 %v4121_v8, %v3059_v22  ;;  %v4437_v24 = vpop.f32.mrb[23].mxu1  ;;  %v3063_v25 = vmul.f32 0.088388346, %v3057_v19  ;;  %v4929_v8 = vld [vmem:[%s6288_s17 + $0x18] sm:$0xff]   ;;  %v4931_v19 = vld [vmem:[%s6288_s17 + $0x28] sm:$0xff]  }
 0x922   : > { %v4933_v22 = vld [vmem:[%s6288_s17 + $0x38] sm:$0xff]   ;;  %v4202_v24 = vld [vmem:[%s6287_s16] ss:$0 sm:$0xff] }
 0x923   : > { %v3064_v26 = vmul.f32 0.088388346, %v3060_v23 }
 0x925   : > { %v3293_v55 = vpack.c.bf16 %v3064_v26, %v3063_v25 }
 0x927   : > { %4481 = vmatmul.mubr.msk.bf16.vlgmr.msra.gmra.mrb[28].mxu1 %vm2823_vm3, %v3293_v55 }
 0x928   : > { %4503 = vmatpush3.bf16.msra.mxu1 %v4918_v28  ;;  %4510 = vmatprep.mubr.msk.bf16.mxu1 %vm5047_vm0, %v5046_v1 }
 0x929   : > { %4504 = vmatprep.subr.bf16.mxu1 %v5046_v1 }
 0x92c   : > { %4505 = vmatpush3.bf16.msra.mxu1 %v4919_v29 }
 0x92d   : > { %4506 = vmatprep.subr.bf16.mxu1 %v5046_v1 }
 0x930   : > { %4507 = vmatpush3.bf16.msra.mxu1 %v4920_v30 }
 0x931   : > { %4508 = vmatprep.subr.bf16.mxu1 %v5046_v1 }
 0x934   : > { %4509 = vmatpush3.bf16.msra.mxu1 %v4921_v7 }
 0x937   : > { %4511 = vmatmul.mubr.msk.bf16.vlgmr.msra.gmra.mrb[32].mxu1 %vm2823_vm3, %v2940_v15  ;;  %v4927_v15 = vld [vmem:[%s6288_s17 + $0x8] sm:$0xff]  }
 0x93e   : > { %v3286_v31 = vpop.f32.mrb[24].mxu1 }
 0x93f   : > { %v4476_v61 = vpop.f32.mrb[25].mxu1  ;;  %v3287_v34 = vadd.f32 %v4173_v46, %v3286_v31 }
 0x940   : > { %v3289_v33 = vpop.f32.mrb[26].mxu1  ;;  %v4203_v61 = vld [vmem:[%s6289_s18] ss:$0 sm:$0xff] }
 0x941   : > { %v3290_v35 = vadd.f32 %v4173_v46, %v3289_v33  ;;  %v4477_v36 = vpop.f32.mrb[27].mxu1 }
 0x943   : > { %v3365_v37 = vpack.c.bf16 %v3290_v35, %v3287_v34 }
 0x945   : > { %4485 = vmatpush3.bf16.msra.mxu0 %v3365_v37 }
 0x946   : > { %4490 = vmatprep.subr.bf16.mxu0 %v5046_v1 }
 0x9fa   : > { %v3335_v38 = vpop.f32.mrb[28].mxu1 }
 0x9fb   : > { %v4482_v27 = vpop.f32.mrb[29].mxu1  ;;  %v3342_v51 = vsel %vm2871_vm4, %v3335_v38, -inf }
 0x9fc   : > { %3343 = vmax.xlane.f32.xlu0 %v3342_v51  ;;  %v3338_v45 = vpop.f32.mrb[30].mxu1 }
 0x9fd   : > { %v4483_v18 = vpop.f32.mrb[31].mxu1  ;;  %v3345_v21 = vsel %vm2871_vm4, %v3338_v45, -inf }
 0x9fe   : > { %3346 = vmax.xlane.f32.xlu1 %v3345_v21 }
 0xa0a   : > { %v6155_v41 = vpop.f32.mrb[32].mxu1 }
 0xa0b   : > { %v4512_v42 = vpop.f32.mrb[33].mxu1 }
 0xa0c   : > { %v6157_v43 = vpop.f32.mrb[34].mxu1 }
 0xa0d   : > { %v4513_v13 = vpop.f32.mrb[35].mxu1 }
 0xa89   : > { %v3344_v44 = vpop.xlane.xlu0 %3343 }
 0xa8a   : > { %v3348_v47 = vsub.f32 %v3335_v38, %v3344_v44 }
 0xa8b   : > { %v3347_v48 = vpop.xlane.xlu1 %3346 }
 0xa8c   : > { %v3350_v49 = vmul.f32 1.442695, %v3348_v47  ;;  %v3349_v50 = vsub.f32 %v3338_v45, %v3347_v48 }
 0xa8e   : > { %4974 = vpow2.f32 %v3350_v49  ;;  %v3352_v52 = vmul.f32 1.442695, %v3349_v50 }
 0xa90   : > { %4976 = vpow2.f32 %v3352_v52 }
 0xa98   : > { %v4975_v53 = vpop.eup %4974 }
 0xa99   : > { %v3354_v54 = vsel %vm2871_vm4, %v4975_v53, 0.0 }
 0xa9a   : > { %v4977_v56 = vpop.eup %4976  ;;  %3355 = vadd.xlane.f32.xlu0 %v3354_v54 }
 0xa9b   : > { %v3357_v57 = vsel %vm2871_vm4, %v4977_v56, 0.0 }
 0xa9c   : > { %3358 = vadd.xlane.f32.xlu1 %v3357_v57 }
 0xb27   : > { %v3356_v58 = vpop.xlane.xlu0 %3355 }
 0xb28   : > { %4978 = vrcp.f32 %v3356_v58 }
 0xb29   : > { %v3359_v32 = vpop.xlane.xlu1 %3358 }
 0xb2a   : > { %4980 = vrcp.f32 %v3359_v32 }
 0xb32   : > { %v4979_v59 = vpop.eup %4978 }
 0xb33   : > { %v3362_v0 = vmul.f32 %v4979_v59, %v4975_v53 }
 0xb34   : > { %v4981_v60 = vpop.eup %4980 }
 0xb35   : > { %v3363_v2 = vmul.f32 %v4981_v60, %v4977_v56 }
 0xb37   : > { %v3364_v4 = vpack.c.bf16 %v3363_v2, %v3362_v0 }
 0xb39   : > { %4487 = vmatmul.mubr.msk.bf16.vlgmr.msra.gmra.mrb[20].mxu0 %vm2871_vm4, %v3364_v4 }
 0xb3a   : > { %4491 = vmatpush3.bf16.msra.mxu0 %v4922_v3  ;;  %4498 = vmatprep.mubr.msk.bf16.mxu0 %vm5047_vm0, %v5046_v1 }
 0xb3b   : > { %4492 = vmatprep.subr.bf16.mxu0 %v5046_v1 }
 0xb3e   : > { %4493 = vmatpush3.bf16.msra.mxu0 %v4923_v5 }
 0xb3f   : > { %4494 = vmatprep.subr.bf16.mxu0 %v5046_v1 }
 0xb42   : > { %4495 = vmatpush3.bf16.msra.mxu0 %v4924_v6 }
 0xb43   : > { %4496 = vmatprep.subr.bf16.mxu0 %v5046_v1 }
 0xb46   : > { %4497 = vmatpush3.bf16.msra.mxu0 %v4925_v9 }
 0xb47   : > { %4514 = vmatprep.subr.bf16.mxu0 %v5046_v1 }
 0xc0c   : > { %v3403_v10 = vpop.f32.mrb[20].mxu0 }
 0xc0d   : > { %v4488_v11 = vpop.f32.mrb[21].mxu0 }
 0xc0e   : > { %v3406_v12 = vpop.f32.mrb[22].mxu0 }
 0xc0f   : > { %v3410_v62 = vpack.c.bf16 %v3406_v12, %v3403_v10  ;;  %v4489_v14 = vpop.f32.mrb[23].mxu0 }
 0xc11   : > { %4499 = vmatmul.mubr.msk.bf16.vlgmr.msra.gmra.mrb[24].mxu0 %vm2823_vm3, %v3410_v62 }
 0xc12   : > { %4515 = vmatpush3.bf16.msra.mxu0 %v4926_v63  ;;  %4530 = vmatprep.mubr.msk.bf16.mxu0 %vm5047_vm0, %v5046_v1 }
 0xc13   : > { %4516 = vmatprep.subr.bf16.mxu0 %v5046_v1 }
 0xc16   : > { %4517 = vmatpush3.bf16.msra.mxu0 %v4927_v15 }
 0xc17   : > { %4518 = vmatprep.subr.bf16.mxu0 %v5046_v1 }
 0xc1a   : > { %4519 = vmatpush3.bf16.msra.mxu0 %v4928_v16 }
 0xc1b   : > { %4520 = vmatprep.subr.bf16.mxu0 %v5046_v1 }
 0xc1e   : > { %4521 = vmatpush3.bf16.msra.mxu0 %v4929_v8 }
 0xc1f   : > { %4522 = vmatprep.subr.bf16.mxu0 %v5046_v1 }
 0xc22   : > { %4523 = vmatpush3.bf16.msra.mxu0 %v4930_v17 }
 0xc23   : > { %4524 = vmatprep.subr.bf16.mxu0 %v5046_v1 }
 0xc26   : > { %4525 = vmatpush3.bf16.msra.mxu0 %v4931_v19 }
 0xc27   : > { %4526 = vmatprep.subr.bf16.mxu0 %v5046_v1 }
 0xc2a   : > { %4527 = vmatpush3.bf16.msra.mxu0 %v4932_v20 }
 0xc2b   : > { %4528 = vmatprep.subr.bf16.mxu0 %v5046_v1 }
 0xc2e   : > { %4529 = vmatpush3.bf16.msra.mxu0 %v4933_v22 }
 0xce4   : > { %v3481_v23 = vpop.f32.mrb[24].mxu0 }
 0xce5   : > { %v3550_v25 = vadd.f32 %v6155_v41, %v3481_v23  ;;  %v4500_v26 = vpop.f32.mrb[25].mxu0 }
 0xce6   : > { %v3484_v28 = vpop.f32.mrb[26].mxu0 }
 0xce7   : > { %v3563_v55 = vadd.f32 %v4202_v24, %v3550_v25  ;;  %v3553_v29 = vadd.f32 %v6157_v43, %v3484_v28  ;;  %v4501_v30 = vpop.f32.mrb[27].mxu0 }
 0xce9   : > { %v3564_v1 = vadd.f32 %v4202_v24, %v3553_v29  ;;  %v3565_v7 = vadd.f32 %v3563_v55, %v5936_v39 }
 0xceb   : > { %v3566_v46 = vadd.f32 %v3564_v1, %v5939_v40 }
 0xced   : > { %v3567_v31 = vpack.c.bf16 %v3566_v46, %v3565_v7 }
 0xcef   : > { %4531 = vmatmul.mubr.bf16.vlgmr.msra.gmra.mrb[28].mxu0 %v3567_v31 }
 0xdc2   : > { %v3673_v33 = vpop.f32.mrb[28].mxu0 }
 0xdc3   : > { %v4532_v34 = vpop.f32.mrb[29].mxu0  ;;  %v3674_v36 = vadd.f32 %v4203_v61, %v3673_v33 }
 0xdc4   : > { %v3676_v35 = vpop.f32.mrb[30].mxu0 }
 0xdc5   : > { %v3677_v37 = vadd.f32 %v4203_v61, %v3676_v35  ;;  %v4533_v38 = vpop.f32.mrb[31].mxu0 }
 0xdc7   : > { %v3680_v27 = vadd.f32 %v3677_v37, %v3674_v36 }
 0xdc9   : > { %v3681_v51 = vrot.slane %v3680_v27, 4 }
 0xdcb   : > { %v3682_v45 = vadd.f32 %v3681_v51, %v3680_v27 }
 0xdcd   : > { %v3683_v39 = vrot.slane %v3682_v45, 2 }
 0xdcf   : > { %v3684_v40 = vadd.f32 %v3683_v39, %v3682_v45 }
 0xdd1   : > { %v3685_v18 = vrot.slane %v3684_v40, 1 }
 0xdd3   : > { %v3686_v21 = vadd.f32 %v3685_v18, %v3684_v40 }
 0xdd5   : > { %v3687_v41 = vmul.f32 0.0625, %v3686_v21 }
 0xdd7   : > { %3688 = vst [vmem:[%s594_s28] sm:$0x1] %v3687_v41 }
 0xdd8   : > { %4995 = shalt.err (!%p4992_p3)
}
 0xdd9   : > { %s4996_s0 = scalar_lea.hbm %s6229_s20, 16  ;;  %s5000_s23 = scalar_lea.hbm %s6321_s27, 32 }
 0xdda   : > { %p4997_p4 = scmp.ne.s32.totalorder %s6229_s20, %s4996_s0  ;;  %p5001_p9 = scmp.lt.u32.totalorder %s6229_s20, %s6321_s27 }
 0xddb   : > { %p5002_p10 = scmp.lt.u32.totalorder %s5000_s23, %s4996_s0  ;;  %p5004_p12 = scmp.lt.u32.totalorder %s4996_s0, %s6229_s20 }
 0xddc   : > { %p4998_p7 = pnand %p4997_p4, %p5189_p5 }
 0xddd   : > { %p5003_p11 = por %p5002_p10, %p5001_p9 }
 0xdde   : > { %p4999_p8 = pneg %p4998_p7 }
 0xddf   : > { %p5005_p13 = por %p5004_p12, %p5003_p11 }
 0xde1   : > { %p5006_p0 = pnand %p5005_p13, %p4999_p8 }
 0xde3   : > { %5009 = shalt.err (!%p5006_p0)
}
 0xde4   : > { %4574 = dma.vmem_to_hbm [thread:$0]  (%p5189_p5), %s6231_s22, 16, %s6229_s20, %s3690_s25  }
 0xde5 PF: > { %s6322_s2 = sld [smem:[#allocation7_spill]]  ;;  %s6323_s26 = sld [smem:[#allocation5_spill]] }
 0xdeb   : > { %p4580_p1 = scmp.ge.s32.totalorder %s6322_s2, 2  ;;  %s3714_s21 = sand.u32 1, %s6323_s26  }
 0xdec   : > { %s3715_s28 = scalar_lea.sflag [#allocation3], %s3714_s21 }
 0xded   : > { %p4577_p2 = pnand %p4580_p1, %p5193_p6 }
 0xdef   : > { %5027 = dma.done.wait (!%p4577_p2), %s3715_s28, 16  }
 0xdf0   : > { %5029 = vsyncadd (!%p4577_p2), %s3715_s28, 4294967280  ;;  %s6325_s21 = sld [smem:[#allocation8_spill]]  ;;  %s6326_s23 = sld [smem:[#allocation6_spill]] }
 0xdf1   : > { %s6327_s20 = sld [smem:[#allocation9_spill]]  ;;  %s6328_s0 = smov %s5036_s30 }
 0xdf6   : > { %p29_p3 = scmp.ge.s32.totalorder %s6325_s21, 4   ;;  %s6329_s30 = smov %s6326_s23 }
 0xdf8   :  { %31 = sbr.rel (!%p29_p3) target bundleno = 9 (0x9), region = 146 }
 0xdff   :  { %3719 = vsyncpa [#allocation3], 1 }
 0xe00   :  { %3721 = vsyncpa [#allocation3 + $0x1], 1 }

</bundles_post_ra>
